<compile_context>
chip_gen: v7x
topology: tpu7x:2x2x1
jax: 0.10.0
libtpu: 0.0.40
codegen_flags: <defaults>
</compile_context>

<pallas_src>
import functools
import math

import jax
import jax.numpy as jnp
from jax.experimental import pallas as pl
from jax.experimental.pallas import tpu as pltpu


def _detect_vmem_limit():
    """Generation-aware scoped-VMEM budget."""
    try:
        kind = jax.devices()[0].device_kind.lower()
    except Exception:  # pragma: no cover - defensive
        kind = ""
    if "v7" in kind:
        return 48 * 1024 * 1024          # 64 MiB physical per TC -> stay conservative
    if "v5" in kind or "v6" in kind:
        return 96 * 1024 * 1024          # 128 MiB physical -> use the headroom
    return 48 * 1024 * 1024              # unknown part -> safe default


VMEM_LIMIT = _detect_vmem_limit()


def _tile(dim, pref, floor):
    """Largest divisor of `dim` that is <= pref and >= floor; else `dim` (full block).

    `floor` is 8 for sublane (second-to-last) dims and 128 for lane (last) dims so the
    returned tile always satisfies the (8,128) block constraint (a full dim is always
    legal).  TODO(synk): pad M up to a tile multiple instead of the full-dim fallback
    for pathological (prime-ish) token counts.
    """
    if dim <= pref:
        return dim
    t = pref
    while t >= floor:
        if dim % t == 0:
            return t
        t //= 2
    return dim


# ---------------------------------------------------------------------------
# Pallas kernels
# ---------------------------------------------------------------------------

def _dense_kernel(x_ref, w_ref, b_ref, o_ref, acc_ref, *, activation):
    """Tiled out = act(x @ w + b); grid = (M/tm, N/tn, K/tk), K innermost."""
    @pl.when(pl.program_id(2) == 0)
    def _():
        acc_ref[...] = jnp.zeros_like(acc_ref)

    acc_ref[...] += jnp.dot(x_ref[...], w_ref[...],
                            preferred_element_type=jnp.float32)

    @pl.when(pl.program_id(2) == pl.num_programs(2) - 1)
    def _():
        y = acc_ref[...] + b_ref[...]
        if activation == "tanh":
            y = jnp.tanh(y)
        elif activation == "gelu":
            # TODO(synk): BERT uses erf-GELU; tanh-approx keeps everything on the EUP.
            c = math.sqrt(2.0 / math.pi)
            y = 0.5 * y * (1.0 + jnp.tanh(c * (y + 0.044715 * y * y * y)))
        o_ref[...] = y.astype(o_ref.dtype)


def dense(x, w, b, activation="none", out_dtype=None, tm=512, tn=512, tk=512):
    M, K = x.shape
    N = w.shape[1]
    tm = _tile(M, tm, 8)
    tn = N if N <= 1024 else _tile(N, tn, 128)
    tk = _tile(K, tk, 128)
    out_dtype = out_dtype or x.dtype
    # TODO(synk): sweep pipeline_mode=pl.Buffered(3) on the weight spec for short-K
    # loops on v7x (3.2 TB/s HBM exposes DMA startup at tile boundaries).
    return pl.pallas_call(
        functools.partial(_dense_kernel, activation=activation),
        out_shape=jax.ShapeDtypeStruct((M, N), out_dtype),
        grid=(M // tm, N // tn, K // tk),
        in_specs=[
            pl.BlockSpec((tm, tk), lambda i, j, k: (i, k)),
            pl.BlockSpec((tk, tn), lambda i, j, k: (k, j)),
            pl.BlockSpec((1, tn), lambda i, j, k: (0, j)),
        ],
        out_specs=pl.BlockSpec((tm, tn), lambda i, j, k: (i, j)),
        scratch_shapes=[pltpu.VMEM((tm, tn), jnp.float32)],
        compiler_params=pltpu.CompilerParams(
            dimension_semantics=("parallel", "parallel", "arbitrary"),
            vmem_limit_bytes=VMEM_LIMIT),
    )(x, w, b.reshape(1, N))


def _dense_res_ln_kernel(x_ref, w_ref, b_ref, res_ref, g_ref, bt_ref,
                         o_ref, acc_ref, *, eps):
    """Tiled out = LayerNorm(x @ w + b + residual); grid = (M/tm, K/tk), N full."""
    @pl.when(pl.program_id(1) == 0)
    def _():
        acc_ref[...] = jnp.zeros_like(acc_ref)

    acc_ref[...] += jnp.dot(x_ref[...], w_ref[...],
                            preferred_element_type=jnp.float32)

    @pl.when(pl.program_id(1) == pl.num_programs(1) - 1)
    def _():
        y = acc_ref[...] + b_ref[...] + res_ref[...].astype(jnp.float32)
        mu = jnp.mean(y, axis=-1, keepdims=True)
        var = jnp.mean((y - mu) ** 2, axis=-1, keepdims=True)
        inv = jax.lax.rsqrt(var + eps)
        o_ref[...] = ((y - mu) * inv * g_ref[...] + bt_ref[...]).astype(o_ref.dtype)


def dense_res_ln(x, w, b, residual, gamma, beta, eps=1e-12, tm=512, tk=512):
    M, K = x.shape
    N = w.shape[1]
    tm = _tile(M, tm, 8)
    tk = _tile(K, tk, 128)
    return pl.pallas_call(
        functools.partial(_dense_res_ln_kernel, eps=eps),
        out_shape=jax.ShapeDtypeStruct((M, N), residual.dtype),
        grid=(M // tm, K // tk),
        in_specs=[
            pl.BlockSpec((tm, tk), lambda i, k: (i, k)),
            pl.BlockSpec((tk, N), lambda i, k: (k, 0)),
            pl.BlockSpec((1, N), lambda i, k: (0, 0)),
            pl.BlockSpec((tm, N), lambda i, k: (i, 0)),
            pl.BlockSpec((1, N), lambda i, k: (0, 0)),
            pl.BlockSpec((1, N), lambda i, k: (0, 0)),
        ],
        out_specs=pl.BlockSpec((tm, N), lambda i, k: (i, 0)),
        scratch_shapes=[pltpu.VMEM((tm, N), jnp.float32)],
        compiler_params=pltpu.CompilerParams(
            dimension_semantics=("parallel", "arbitrary"),
            vmem_limit_bytes=VMEM_LIMIT),
    )(x, w, b.reshape(1, N), residual, gamma.reshape(1, N), beta.reshape(1, N))


def _layernorm_kernel(x_ref, g_ref, b_ref, o_ref, *, eps):
    x = x_ref[...].astype(jnp.float32)
    mu = jnp.mean(x, axis=-1, keepdims=True)
    var = jnp.mean((x - mu) ** 2, axis=-1, keepdims=True)
    inv = jax.lax.rsqrt(var + eps)
    o_ref[...] = ((x - mu) * inv * g_ref[...] + b_ref[...]).astype(o_ref.dtype)


def layernorm(x, gamma, beta, out_dtype, eps=1e-12, tm=512):
    M, H = x.shape
    tm = _tile(M, tm, 8)
    return pl.pallas_call(
        functools.partial(_layernorm_kernel, eps=eps),
        out_shape=jax.ShapeDtypeStruct((M, H), out_dtype),
        grid=(M // tm,),
        in_specs=[
            pl.BlockSpec((tm, H), lambda i: (i, 0)),
            pl.BlockSpec((1, H), lambda i: (0, 0)),
            pl.BlockSpec((1, H), lambda i: (0, 0)),
        ],
        out_specs=pl.BlockSpec((tm, H), lambda i: (i, 0)),
        compiler_params=pltpu.CompilerParams(
            dimension_semantics=("parallel",), vmem_limit_bytes=VMEM_LIMIT),
    )(x, gamma.reshape(1, H), beta.reshape(1, H))


def _attn_kernel(mask_ref, qkv_ref, o_ref, acc_ref, *, nH, dh, tq, scale):
    """One (batch, q-tile) per grid step.

    qkv block is the full (S, 3H) slab for this batch element (resident across q
    tiles); output block is the lane-dense (tq, H) slice for this q tile.  Per-head
    scores are only (tq, S), contexts accumulate into a (tq, H) f32 VMEM scratch at
    their lane offset, and one cast+store writes the output block.
    """
    H = nH * dh
    qi = pl.program_id(1)
    q0 = pl.multiple_of(qi * tq, tq)
    bias = (1.0 - mask_ref[...].astype(jnp.float32)) * -10000.0   # (1, S) key-pad mask

    # TODO(synk): for dh=64 (real BERT) slice head PAIRS (128 lanes) of qkv to keep
    # every extraction vreg-aligned; per-head slices are kept here for generality.
    for h in range(nH):                                           # static unroll
        q = qkv_ref[pl.ds(q0, tq), h * dh:(h + 1) * dh]           # (tq, dh)
        k = qkv_ref[:, H + h * dh:H + (h + 1) * dh]               # (S,  dh)
        v = qkv_ref[:, 2 * H + h * dh:2 * H + (h + 1) * dh]       # (S,  dh)
        # Contract the last dims directly: no XLU transpose of k.
        s = jax.lax.dot_general(q, k, (((1,), (1,)), ((), ())),
                                preferred_element_type=jnp.float32) * scale + bias
        m = jnp.max(s, axis=-1, keepdims=True)
        p = jnp.exp(s - m)
        denom = jnp.sum(p, axis=-1, keepdims=True)
        # TODO(synk): on v6e/v7x the prob matrix could be kept bf16 post max-subtract.
        p = p * pl.reciprocal(denom, approx=True)
        acc_ref[:, h * dh:(h + 1) * dh] = jnp.dot(
            p.astype(v.dtype), v, preferred_element_type=jnp.float32)

    o_ref[...] = acc_ref[...].astype(o_ref.dtype)                 # one lane-dense store


def attention(mask, qkv, *, nH, dh):
    B, S, H3 = qkv.shape
    H = nH * dh
    tq = _tile(S, 128, 8)            # flash-style q tile (full S when S <= 128)
    n_q = S // tq
    return pl.pallas_call(
        functools.partial(_attn_kernel, nH=nH, dh=dh, tq=tq,
                          scale=1.0 / math.sqrt(dh)),
        out_shape=jax.ShapeDtypeStruct((B, S, H), qkv.dtype),
        grid=(B, n_q),
        in_specs=[
            pl.BlockSpec((None, 1, S), lambda b, qi: (b, 0, 0)),
            pl.BlockSpec((None, S, H3), lambda b, qi: (b, 0, 0)),
        ],
        out_specs=pl.BlockSpec((None, tq, H), lambda b, qi: (b, qi, 0)),
        scratch_shapes=[pltpu.VMEM((tq, H), jnp.float32)],
        compiler_params=pltpu.CompilerParams(
            dimension_semantics=("parallel", "parallel"),   # B and q-tiles shardable
            vmem_limit_bytes=VMEM_LIMIT),
    )(mask, qkv)


def _pooler_cls_kernel(x_ref, pw_ref, pb_ref, cw_ref, cb_ref, o_ref):
    """Fused pooler (Linear+tanh on [CLS]) + NSP head, lane-padded to 128 outputs."""
    pooled = jnp.tanh(
        jnp.dot(x_ref[...], pw_ref[...], preferred_element_type=jnp.float32)
        + pb_ref[...])
    score = jnp.dot(pooled.astype(cw_ref.dtype), cw_ref[...],
                    preferred_element_type=jnp.float32) + cb_ref[...]
    o_ref[...] = score.astype(o_ref.dtype)


def pooler_cls(first_tok, pw, pb, cw_pad, cb_pad):
    B, H = first_tok.shape
    NP = cw_pad.shape[1]
    return pl.pallas_call(
        _pooler_cls_kernel,
        out_shape=jax.ShapeDtypeStruct((B, NP), jnp.float32),
        grid=(1,),
        in_specs=[
            pl.BlockSpec((B, H), lambda i: (0, 0)),
            pl.BlockSpec((H, H), lambda i: (0, 0)),
            pl.BlockSpec((1, H), lambda i: (0, 0)),
            pl.BlockSpec((H, NP), lambda i: (0, 0)),
            pl.BlockSpec((1, NP), lambda i: (0, 0)),
        ],
        out_specs=pl.BlockSpec((B, NP), lambda i: (0, 0)),
        compiler_params=pltpu.CompilerParams(vmem_limit_bytes=VMEM_LIMIT),
    )(first_tok, pw, pb.reshape(1, H), cw_pad, cb_pad.reshape(1, NP))


# ---------------------------------------------------------------------------
# Model glue (plain JAX: embedding gathers, reshapes, parameter setup)
# ---------------------------------------------------------------------------

def init_params(key, *, vocab, max_pos, type_vocab, H, nH, inter, layers):
    keys = iter(jax.random.split(key, 8 * layers + 16))
    std = 0.02

    def nrm(shape, dtype=jnp.bfloat16):
        return (std * jax.random.normal(next(keys), shape, dtype=jnp.float32)).astype(dtype)

    params = {
        "word_emb": nrm((vocab, H), jnp.float32),
        "pos_emb": nrm((max_pos, H), jnp.float32),
        "type_emb": nrm((type_vocab, H), jnp.float32),
        "emb_ln_g": jnp.ones((H,), jnp.float32),
        "emb_ln_b": jnp.zeros((H,), jnp.float32),
        "layers": [],
        "pooler_w": nrm((H, H)),
        "pooler_b": jnp.zeros((H,), jnp.float32),
    }
    for _ in range(layers):
        wq, wk, wv = nrm((H, H)), nrm((H, H)), nrm((H, H))
        params["layers"].append({
            "wqkv": jnp.concatenate([wq, wk, wv], axis=1),   # fused Q|K|V [H, 3H]
            "bqkv": jnp.zeros((3 * H,), jnp.float32),
            "wo": nrm((H, H)), "bo": jnp.zeros((H,), jnp.float32),
            "ln1_g": jnp.ones((H,), jnp.float32), "ln1_b": jnp.zeros((H,), jnp.float32),
            "wi": nrm((H, inter)), "bi": jnp.zeros((inter,), jnp.float32),
            "wout": nrm((inter, H)), "bout": jnp.zeros((H,), jnp.float32),
            "ln2_g": jnp.ones((H,), jnp.float32), "ln2_b": jnp.zeros((H,), jnp.float32),
        })
    # NSP head (self.cls.seq_relationship): xavier_uniform for dim>1 params,
    # zero-padded to a lane-dense 128 columns (sliced back to 2 in JAX).
    limit = math.sqrt(6.0 / (H + 2))
    cls_w = jax.random.uniform(next(keys), (H, 2), minval=-limit, maxval=limit,
                               dtype=jnp.float32)
    params["cls_w_pad"] = jnp.pad(cls_w, ((0, 0), (0, 126))).astype(jnp.bfloat16)
    params["cls_b_pad"] = jnp.zeros((128,), jnp.float32)
    return params


def bert_layer(h, lp, mask, B, S, nH, dh, H):
    qkv = dense(h, lp["wqkv"], lp["bqkv"])                       # (B*S, 3H) bf16
    ctx = attention(mask, qkv.reshape(B, S, 3 * H), nH=nH, dh=dh)
    ctx = ctx.reshape(B * S, H)
    # attention output projection + residual + LayerNorm fused
    h = dense_res_ln(ctx, lp["wo"], lp["bo"], h, lp["ln1_g"], lp["ln1_b"])
    inter = dense(h, lp["wi"], lp["bi"], activation="gelu")
    # FFN output projection + residual + LayerNorm fused
    h = dense_res_ln(inter, lp["wout"], lp["bout"], h, lp["ln2_g"], lp["ln2_b"])
    return h


@functools.partial(jax.jit, static_argnames=("nH",))
def next_sentence_prediction_forward(params, input_ids, attention_mask,
                                     token_type_ids, *, nH):
    B, S = input_ids.shape
    H = params["word_emb"].shape[1]
    dh = H // nH

    # Embeddings (gathers are glue).  Sum is cast to bf16 BEFORE the LayerNorm kernel
    # to halve the HBM round-trip of the (B*S, H) slab; LN stats stay f32 in-kernel.
    pos_ids = jnp.arange(S, dtype=jnp.int32)
    emb = (jnp.take(params["word_emb"], input_ids, axis=0)
           + jnp.take(params["pos_emb"], pos_ids, axis=0)[None, :, :]
           + jnp.take(params["type_emb"], token_type_ids, axis=0))
    h = layernorm(emb.reshape(B * S, H).astype(jnp.bfloat16),
                  params["emb_ln_g"], params["emb_ln_b"], out_dtype=jnp.bfloat16)
    # TODO(synk): embedding / hidden / attention dropouts are identity (eval mode).

    # (B, 1, S) key-padding mask; broadcast to bias inside the attention kernel.
    mask = attention_mask.astype(jnp.float32).reshape(B, 1, S)

    for lp in params["layers"]:
        h = bert_layer(h, lp, mask, B, S, nH, dh, H)

    # Pooler (Linear + tanh on the [CLS] token) fused with the NSP head.
    first_tok = h.reshape(B, S, H)[:, 0, :]
    score_pad = pooler_cls(first_tok, params["pooler_w"], params["pooler_b"],
                           params["cls_w_pad"], params["cls_b_pad"])
    seq_relationship_score = score_pad[:, :2]
    return (seq_relationship_score,)


# ---------------------------------------------------------------------------
# Main
# ---------------------------------------------------------------------------

if __name__ == "__main__":
    B, S, H, nH, layers = 2, 16, 64, 4, 2
    vocab, max_pos, type_vocab, inter = 100, 64, 2, 128

    key = jax.random.PRNGKey(0)
    k_param, k_ids, k_tt = jax.random.split(key, 3)

    params = init_params(k_param, vocab=vocab, max_pos=max_pos,
                         type_vocab=type_vocab, H=H, nH=nH,
                         inter=inter, layers=layers)

    input_ids = jax.random.randint(k_ids, (B, S), 0, vocab, dtype=jnp.int32)
    attention_mask = jnp.ones((B, S), dtype=jnp.int32)
    token_type_ids = jnp.concatenate(
        [jnp.zeros((B, S // 2), jnp.int32), jnp.ones((B, S - S // 2), jnp.int32)],
        axis=1)

    outputs = next_sentence_prediction_forward(
        params, input_ids, attention_mask, token_type_ids, nH=nH)
    score = jax.block_until_ready(outputs[0])
    assert score.shape == (B, 2) and score.dtype == jnp.float32
    print("KERNEL_OK")
</pallas_src>

<mosaic_0001>
module attributes {stable_mosaic.version = 11 : i64} {
  func.func @_layernorm_kernel(%arg0: i32, %arg1: memref<32x64xbf16, #tpu.memory_space<vmem>>, %arg2: memref<1x64xf32, #tpu.memory_space<vmem>>, %arg3: memref<1x64xf32, #tpu.memory_space<vmem>>, %arg4: memref<32x64xbf16, #tpu.memory_space<vmem>>) attributes {dimension_semantics = [#tpu.dimension_semantics<parallel>], iteration_bounds = array<i64: 1>, scalar_prefetch = 0 : i64, scratch_operands = 0 : i64, tpu.core_type = #tpu.core_type<tc>, window_params = [{transform_indices = @transform_0, window_bounds = array<i64: 32, 64>}, {pipeline_mode = #tpu.pipeline_mode<synchronous>, transform_indices = @transform_1, window_bounds = array<i64: 1, 64>}, {pipeline_mode = #tpu.pipeline_mode<synchronous>, transform_indices = @transform_2, window_bounds = array<i64: 1, 64>}, {transform_indices = @transform_3, window_bounds = array<i64: 32, 64>}]} {
    %c0 = arith.constant 0 : index
    %c0_0 = arith.constant 0 : index
    %0 = vector.load %arg1[%c0, %c0_0] : memref<32x64xbf16, #tpu.memory_space<vmem>>, vector<32x64xbf16>
    %1 = arith.extf %0 : vector<32x64xbf16> to vector<32x64xf32>
    %cst = arith.constant dense<0.000000e+00> : vector<32xf32>
    %2 = vector.multi_reduction <add>, %1, %cst [1] : vector<32x64xf32> to vector<32xf32>
    %3 = vector.shape_cast %2 : vector<32xf32> to vector<32x1xf32>
    %cst_1 = arith.constant 6.400000e+01 : f32
    %4 = vector.broadcast %cst_1 : f32 to vector<32x1xf32>
    %5 = arith.divf %3, %4 : vector<32x1xf32>
    %6 = vector.broadcast %5 : vector<32x1xf32> to vector<32x64xf32>
    %7 = arith.subf %1, %6 : vector<32x64xf32>
    %8 = arith.mulf %7, %7 : vector<32x64xf32>
    %cst_2 = arith.constant dense<0.000000e+00> : vector<32xf32>
    %9 = vector.multi_reduction <add>, %8, %cst_2 [1] : vector<32x64xf32> to vector<32xf32>
    %10 = vector.shape_cast %9 : vector<32xf32> to vector<32x1xf32>
    %cst_3 = arith.constant 6.400000e+01 : f32
    %11 = vector.broadcast %cst_3 : f32 to vector<32x1xf32>
    %12 = arith.divf %10, %11 : vector<32x1xf32>
    %cst_4 = arith.constant 9.99999996E-13 : f32
    %13 = vector.broadcast %cst_4 : f32 to vector<32x1xf32>
    %14 = arith.addf %12, %13 : vector<32x1xf32>
    %15 = math.rsqrt %14 : vector<32x1xf32>
    %16 = vector.broadcast %5 : vector<32x1xf32> to vector<32x64xf32>
    %17 = arith.subf %1, %16 : vector<32x64xf32>
    %18 = vector.broadcast %15 : vector<32x1xf32> to vector<32x64xf32>
    %19 = arith.mulf %17, %18 : vector<32x64xf32>
    %c0_5 = arith.constant 0 : index
    %c0_6 = arith.constant 0 : index
    %20 = vector.load %arg2[%c0_5, %c0_6] : memref<1x64xf32, #tpu.memory_space<vmem>>, vector<1x64xf32>
    %21 = vector.broadcast %20 : vector<1x64xf32> to vector<32x64xf32>
    %22 = arith.mulf %19, %21 : vector<32x64xf32>
    %c0_7 = arith.constant 0 : index
    %c0_8 = arith.constant 0 : index
    %23 = vector.load %arg3[%c0_7, %c0_8] : memref<1x64xf32, #tpu.memory_space<vmem>>, vector<1x64xf32>
    %24 = vector.broadcast %23 : vector<1x64xf32> to vector<32x64xf32>
    %25 = arith.addf %22, %24 : vector<32x64xf32>
    %26 = arith.truncf %25 : vector<32x64xf32> to vector<32x64xbf16>
    %c0_9 = arith.constant 0 : index
    %c0_10 = arith.constant 0 : index
    %27 = vector.load %arg4[%c0_9, %c0_10] : memref<32x64xbf16, #tpu.memory_space<vmem>>, vector<32x64xbf16>
    tpu.vector_store %arg4[%c0_9, %c0_10], %26 {strides = array<i32>} : memref<32x64xbf16, #tpu.memory_space<vmem>>, vector<32x64xbf16>,
    return
  }
  func.func @transform_0(%arg0: i32) -> (i32, i32) {
    %c0_i32 = arith.constant 0 : i32
    %c0_i32_0 = arith.constant 0 : i32
    return %arg0, %c0_i32 : i32, i32
  }
  func.func @transform_1(%arg0: i32) -> (i32, i32) {
    %c0_i32 = arith.constant 0 : i32
    %c0_i32_0 = arith.constant 0 : i32
    %c0_i32_1 = arith.constant 0 : i32
    return %c0_i32, %c0_i32_0 : i32, i32
  }
  func.func @transform_2(%arg0: i32) -> (i32, i32) {
    %c0_i32 = arith.constant 0 : i32
    %c0_i32_0 = arith.constant 0 : i32
    %c0_i32_1 = arith.constant 0 : i32
    return %c0_i32, %c0_i32_0 : i32, i32
  }
  func.func @transform_3(%arg0: i32) -> (i32, i32) {
    %c0_i32 = arith.constant 0 : i32
    %c0_i32_0 = arith.constant 0 : i32
    return %arg0, %c0_i32 : i32, i32
  }
}

module attributes {stable_mosaic.version = 11 : i64} {
  func.func @_dense_kernel(%arg0: i32, %arg1: i32, %arg2: i32, %arg3: memref<32x64xbf16, #tpu.memory_space<vmem>>, %arg4: memref<64x192xbf16, #tpu.memory_space<vmem>>, %arg5: memref<1x192xf32, #tpu.memory_space<vmem>>, %arg6: memref<32x192xbf16, #tpu.memory_space<vmem>>, %arg7: memref<32x192xf32, #tpu.memory_space<vmem>>) attributes {dimension_semantics = [#tpu.dimension_semantics<parallel>, #tpu.dimension_semantics<parallel>, #tpu.dimension_semantics<arbitrary>], iteration_bounds = array<i64: 1, 1, 1>, scalar_prefetch = 0 : i64, scratch_operands = 1 : i64, tpu.core_type = #tpu.core_type<tc>, window_params = [{transform_indices = @transform_0, window_bounds = array<i64: 32, 64>}, {transform_indices = @transform_1, window_bounds = array<i64: 64, 192>}, {transform_indices = @transform_2, window_bounds = array<i64: 1, 192>}, {transform_indices = @transform_3, window_bounds = array<i64: 32, 192>}]} {
    %c0_i32 = arith.constant 0 : i32
    %0 = arith.cmpi eq, %arg2, %c0_i32 : i32
    %1 = arith.extui %0 : i1 to i32
    %c0_i32_0 = arith.constant 0 : i32
    %2 = arith.cmpi ne, %1, %c0_i32_0 : i32
    scf.if %2 {
      %cst_10 = arith.constant 0.000000e+00 : f32
      %12 = vector.broadcast %cst_10 : f32 to vector<32x192xf32>
      %c0_11 = arith.constant 0 : index
      %c0_12 = arith.constant 0 : index
      %13 = vector.load %arg7[%c0_11, %c0_12] : memref<32x192xf32, #tpu.memory_space<vmem>>, vector<32x192xf32>
      tpu.vector_store %arg7[%c0_11, %c0_12], %12 {strides = array<i32>} : memref<32x192xf32, #tpu.memory_space<vmem>>, vector<32x192xf32>,
    } else {
    }
    %c0 = arith.constant 0 : index
    %c0_1 = arith.constant 0 : index
    %3 = vector.load %arg7[%c0, %c0_1] : memref<32x192xf32, #tpu.memory_space<vmem>>, vector<32x192xf32>
    %c0_2 = arith.constant 0 : index
    %c0_3 = arith.constant 0 : index
    %4 = vector.load %arg3[%c0_2, %c0_3] : memref<32x64xbf16, #tpu.memory_space<vmem>>, vector<32x64xbf16>
    %c0_4 = arith.constant 0 : index
    %c0_5 = arith.constant 0 : index
    %5 = vector.load %arg4[%c0_4, %c0_5] : memref<64x192xbf16, #tpu.memory_space<vmem>>, vector<64x192xbf16>
    %cst = arith.constant dense<0.000000e+00> : vector<32x192xf32>
    %6 = tpu.matmul %4, %5, %cst {dimension_numbers = #tpu.dot_dimension_numbers<[1], [0], [0], [1], [0, 0, 1, 1], [], []>} : vector<32x64xbf16>, vector<64x192xbf16>, vector<32x192xf32> -> vector<32x192xf32>
    %7 = arith.addf %3, %6 : vector<32x192xf32>
    %c0_6 = arith.constant 0 : index
    %c0_7 = arith.constant 0 : index
    %8 = vector.load %arg7[%c0_6, %c0_7] : memref<32x192xf32, #tpu.memory_space<vmem>>, vector<32x192xf32>
    tpu.vector_store %arg7[%c0_6, %c0_7], %7 {strides = array<i32>} : memref<32x192xf32, #tpu.memory_space<vmem>>, vector<32x192xf32>,
    %c0_i32_8 = arith.constant 0 : i32
    %9 = arith.cmpi eq, %arg2, %c0_i32_8 : i32
    %10 = arith.extui %9 : i1 to i32
    %c0_i32_9 = arith.constant 0 : i32
    %11 = arith.cmpi ne, %10, %c0_i32_9 : i32
    scf.if %11 {
      %c0_10 = arith.constant 0 : index
      %c0_11 = arith.constant 0 : index
      %12 = vector.load %arg7[%c0_10, %c0_11] : memref<32x192xf32, #tpu.memory_space<vmem>>, vector<32x192xf32>
      %c0_12 = arith.constant 0 : index
      %c0_13 = arith.constant 0 : index
      %13 = vector.load %arg5[%c0_12, %c0_13] : memref<1x192xf32, #tpu.memory_space<vmem>>, vector<1x192xf32>
      %14 = vector.broadcast %13 : vector<1x192xf32> to vector<32x192xf32>
      %15 = arith.addf %12, %14 : vector<32x192xf32>
      %16 = arith.truncf %15 : vector<32x192xf32> to vector<32x192xbf16>
      %c0_14 = arith.constant 0 : index
      %c0_15 = arith.constant 0 : index
      %17 = vector.load %arg6[%c0_14, %c0_15] : memref<32x192xbf16, #tpu.memory_space<vmem>>, vector<32x192xbf16>
      tpu.vector_store %arg6[%c0_14, %c0_15], %16 {strides = array<i32>} : memref<32x192xbf16, #tpu.memory_space<vmem>>, vector<32x192xbf16>,
    } else {
    }
    return
  }
  func.func @transform_0(%arg0: i32, %arg1: i32, %arg2: i32) -> (i32, i32) {
    %c0_i32 = arith.constant 0 : i32
    return %arg0, %arg2 : i32, i32
  }
  func.func @transform_1(%arg0: i32, %arg1: i32, %arg2: i32) -> (i32, i32) {
    %c0_i32 = arith.constant 0 : i32
    return %arg2, %arg1 : i32, i32
  }
  func.func @transform_2(%arg0: i32, %arg1: i32, %arg2: i32) -> (i32, i32) {
    %c0_i32 = arith.constant 0 : i32
    %c0_i32_0 = arith.constant 0 : i32
    return %c0_i32, %arg1 : i32, i32
  }
  func.func @transform_3(%arg0: i32, %arg1: i32, %arg2: i32) -> (i32, i32) {
    %c0_i32 = arith.constant 0 : i32
    return %arg0, %arg1 : i32, i32
  }
}

module attributes {stable_mosaic.version = 11 : i64} {
  func.func @_attn_kernel(%arg0: i32, %arg1: i32, %arg2: memref<1x1x16xf32, #tpu.memory_space<vmem>>, %arg3: memref<1x16x192xbf16, #tpu.memory_space<vmem>>, %arg4: memref<1x16x64xbf16, #tpu.memory_space<vmem>>, %arg5: memref<16x64xf32, #tpu.memory_space<vmem>>) attributes {dimension_semantics = [#tpu.dimension_semantics<parallel>, #tpu.dimension_semantics<parallel>], iteration_bounds = array<i64: 2, 1>, scalar_prefetch = 0 : i64, scratch_operands = 1 : i64, tpu.core_type = #tpu.core_type<tc>, window_params = [{transform_indices = @transform_0, window_bounds = array<i64: 1, 1, 16>}, {transform_indices = @transform_1, window_bounds = array<i64: 1, 16, 192>}, {transform_indices = @transform_2, window_bounds = array<i64: 1, 16, 64>}]} {
    %c16_i32 = arith.constant 16 : i32
    %0 = arith.muli %arg1, %c16_i32 : i32
    %1 = tpu.assume_multiple %0, 16 : i32
    %c0 = arith.constant 0 : index
    %c0_0 = arith.constant 0 : index
    %c0_1 = arith.constant 0 : index
    %2 = vector.load %arg2[%c0, %c0_0, %c0_1] : memref<1x1x16xf32, #tpu.memory_space<vmem>>, vector<1x1x16xf32>
    %3 = vector.shape_cast %2 : vector<1x1x16xf32> to vector<1x16xf32>
    %cst = arith.constant 1.000000e+00 : f32
    %4 = vector.broadcast %cst : f32 to vector<1x16xf32>
    %5 = arith.subf %4, %3 : vector<1x16xf32>
    %cst_2 = arith.constant -1.000000e+04 : f32
    %6 = vector.broadcast %cst_2 : f32 to vector<1x16xf32>
    %7 = arith.mulf %5, %6 : vector<1x16xf32>
    %c0_3 = arith.constant 0 : index
    %8 = arith.index_cast %1 : i32 to index
    %c0_4 = arith.constant 0 : index
    %9 = vector.load %arg3[%c0_3, %8, %c0_4] : memref<1x16x192xbf16, #tpu.memory_space<vmem>>, vector<1x16x16xbf16>
    %10 = vector.shape_cast %9 : vector<1x16x16xbf16> to vector<16x16xbf16>
    %c0_5 = arith.constant 0 : index
    %c0_6 = arith.constant 0 : index
    %c64 = arith.constant 64 : index
    %11 = vector.load %arg3[%c0_5, %c0_6, %c64] : memref<1x16x192xbf16, #tpu.memory_space<vmem>>, vector<1x16x16xbf16>
    %12 = vector.shape_cast %11 : vector<1x16x16xbf16> to vector<16x16xbf16>
    %c0_7 = arith.constant 0 : index
    %c0_8 = arith.constant 0 : index
    %c128 = arith.constant 128 : index
    %13 = vector.load %arg3[%c0_7, %c0_8, %c128] : memref<1x16x192xbf16, #tpu.memory_space<vmem>>, vector<1x16x16xbf16>
    %14 = vector.shape_cast %13 : vector<1x16x16xbf16> to vector<16x16xbf16>
    %cst_9 = arith.constant dense<0.000000e+00> : vector<16x16xf32>
    %15 = tpu.matmul %10, %12, %cst_9 {dimension_numbers = #tpu.dot_dimension_numbers<[1], [1], [0], [0], [0, 0, 1, 0], [], []>} : vector<16x16xbf16>, vector<16x16xbf16>, vector<16x16xf32> -> vector<16x16xf32>
    %cst_10 = arith.constant 2.500000e-01 : f32
    %16 = vector.broadcast %cst_10 : f32 to vector<16x16xf32>
    %17 = arith.mulf %15, %16 : vector<16x16xf32>
    %18 = vector.broadcast %7 : vector<1x16xf32> to vector<16x16xf32>
    %19 = arith.addf %17, %18 : vector<16x16xf32>
    %cst_11 = arith.constant dense<0xFF800000> : vector<16xf32>
    %20 = vector.multi_reduction <maximumf>, %19, %cst_11 [1] : vector<16x16xf32> to vector<16xf32>
    %21 = vector.shape_cast %20 : vector<16xf32> to vector<16x1xf32>
    %22 = vector.broadcast %21 : vector<16x1xf32> to vector<16x16xf32>
    %23 = arith.subf %19, %22 : vector<16x16xf32>
    %24 = math.exp %23 : vector<16x16xf32>
    %cst_12 = arith.constant dense<0.000000e+00> : vector<16xf32>
    %25 = vector.multi_reduction <add>, %24, %cst_12 [1] : vector<16x16xf32> to vector<16xf32>
    %26 = vector.shape_cast %25 : vector<16xf32> to vector<16x1xf32>
    %27 = tpu.reciprocal %26 {approx = true} : vector<16x1xf32> -> vector<16x1xf32>
    %28 = vector.broadcast %27 : vector<16x1xf32> to vector<16x16xf32>
    %29 = arith.mulf %24, %28 : vector<16x16xf32>
    %30 = arith.truncf %29 : vector<16x16xf32> to vector<16x16xbf16>
    %cst_13 = arith.constant dense<0.000000e+00> : vector<16x16xf32>
    %31 = tpu.matmul %30, %14, %cst_13 {dimension_numbers = #tpu.dot_dimension_numbers<[1], [0], [0], [1], [0, 0, 1, 1], [], []>} : vector<16x16xbf16>, vector<16x16xbf16>, vector<16x16xf32> -> vector<16x16xf32>
    %c0_14 = arith.constant 0 : index
    %c0_15 = arith.constant 0 : index
    %32 = vector.load %arg5[%c0_14, %c0_15] : memref<16x64xf32, #tpu.memory_space<vmem>>, vector<16x16xf32>
    tpu.vector_store %arg5[%c0_14, %c0_15], %31 {strides = array<i32>} : memref<16x64xf32, #tpu.memory_space<vmem>>, vector<16x16xf32>,
    %c0_16 = arith.constant 0 : index
    %33 = arith.index_cast %1 : i32 to index
    %c16 = arith.constant 16 : index
    %34 = vector.load %arg3[%c0_16, %33, %c16] : memref<1x16x192xbf16, #tpu.memory_space<vmem>>, vector<1x16x16xbf16>
    %35 = vector.shape_cast %34 : vector<1x16x16xbf16> to vector<16x16xbf16>
    %c0_17 = arith.constant 0 : index
    %c0_18 = arith.constant 0 : index
    %c80 = arith.constant 80 : index
    %36 = vector.load %arg3[%c0_17, %c0_18, %c80] : memref<1x16x192xbf16, #tpu.memory_space<vmem>>, vector<1x16x16xbf16>
    %37 = vector.shape_cast %36 : vector<1x16x16xbf16> to vector<16x16xbf16>
    %c0_19 = arith.constant 0 : index
    %c0_20 = arith.constant 0 : index
    %c144 = arith.constant 144 : index
    %38 = vector.load %arg3[%c0_19, %c0_20, %c144] : memref<1x16x192xbf16, #tpu.memory_space<vmem>>, vector<1x16x16xbf16>
    %39 = vector.shape_cast %38 : vector<1x16x16xbf16> to vector<16x16xbf16>
    %cst_21 = arith.constant dense<0.000000e+00> : vector<16x16xf32>
    %40 = tpu.matmul %35, %37, %cst_21 {dimension_numbers = #tpu.dot_dimension_numbers<[1], [1], [0], [0], [0, 0, 1, 0], [], []>} : vector<16x16xbf16>, vector<16x16xbf16>, vector<16x16xf32> -> vector<16x16xf32>
    %cst_22 = arith.constant 2.500000e-01 : f32
    %41 = vector.broadcast %cst_22 : f32 to vector<16x16xf32>
    %42 = arith.mulf %40, %41 : vector<16x16xf32>
    %43 = vector.broadcast %7 : vector<1x16xf32> to vector<16x16xf32>
    %44 = arith.addf %42, %43 : vector<16x16xf32>
    %cst_23 = arith.constant dense<0xFF800000> : vector<16xf32>
    %45 = vector.multi_reduction <maximumf>, %44, %cst_23 [1] : vector<16x16xf32> to vector<16xf32>
    %46 = vector.shape_cast %45 : vector<16xf32> to vector<16x1xf32>
    %47 = vector.broadcast %46 : vector<16x1xf32> to vector<16x16xf32>
    %48 = arith.subf %44, %47 : vector<16x16xf32>
    %49 = math.exp %48 : vector<16x16xf32>
    %cst_24 = arith.constant dense<0.000000e+00> : vector<16xf32>
    %50 = vector.multi_reduction <add>, %49, %cst_24 [1] : vector<16x16xf32> to vector<16xf32>
    %51 = vector.shape_cast %50 : vector<16xf32> to vector<16x1xf32>
    %52 = tpu.reciprocal %51 {approx = true} : vector<16x1xf32> -> vector<16x1xf32>
    %53 = vector.broadcast %52 : vector<16x1xf32> to vector<16x16xf32>
    %54 = arith.mulf %49, %53 : vector<16x16xf32>
    %55 = arith.truncf %54 : vector<16x16xf32> to vector<16x16xbf16>
    %cst_25 = arith.constant dense<0.000000e+00> : vector<16x16xf32>
    %56 = tpu.matmul %55, %39, %cst_25 {dimension_numbers = #tpu.dot_dimension_numbers<[1], [0], [0], [1], [0, 0, 1, 1], [], []>} : vector<16x16xbf16>, vector<16x16xbf16>, vector<16x16xf32> -> vector<16x16xf32>
    %c0_26 = arith.constant 0 : index
    %c16_27 = arith.constant 16 : index
    %57 = vector.load %arg5[%c0_26, %c16_27] : memref<16x64xf32, #tpu.memory_space<vmem>>, vector<16x16xf32>
    tpu.vector_store %arg5[%c0_26, %c16_27], %56 {strides = array<i32>} : memref<16x64xf32, #tpu.memory_space<vmem>>, vector<16x16xf32>,
    %c0_28 = arith.constant 0 : index
    %58 = arith.index_cast %1 : i32 to index
    %c32 = arith.constant 32 : index
    %59 = vector.load %arg3[%c0_28, %58, %c32] : memref<1x16x192xbf16, #tpu.memory_space<vmem>>, vector<1x16x16xbf16>
    %60 = vector.shape_cast %59 : vector<1x16x16xbf16> to vector<16x16xbf16>
    %c0_29 = arith.constant 0 : index
    %c0_30 = arith.constant 0 : index
    %c96 = arith.constant 96 : index
    %61 = vector.load %arg3[%c0_29, %c0_30, %c96] : memref<1x16x192xbf16, #tpu.memory_space<vmem>>, vector<1x16x16xbf16>
    %62 = vector.shape_cast %61 : vector<1x16x16xbf16> to vector<16x16xbf16>
    %c0_31 = arith.constant 0 : index
    %c0_32 = arith.constant 0 : index
    %c160 = arith.constant 160 : index
    %63 = vector.load %arg3[%c0_31, %c0_32, %c160] : memref<1x16x192xbf16, #tpu.memory_space<vmem>>, vector<1x16x16xbf16>
    %64 = vector.shape_cast %63 : vector<1x16x16xbf16> to vector<16x16xbf16>
    %cst_33 = arith.constant dense<0.000000e+00> : vector<16x16xf32>
    %65 = tpu.matmul %60, %62, %cst_33 {dimension_numbers = #tpu.dot_dimension_numbers<[1], [1], [0], [0], [0, 0, 1, 0], [], []>} : vector<16x16xbf16>, vector<16x16xbf16>, vector<16x16xf32> -> vector<16x16xf32>
    %cst_34 = arith.constant 2.500000e-01 : f32
    %66 = vector.broadcast %cst_34 : f32 to vector<16x16xf32>
    %67 = arith.mulf %65, %66 : vector<16x16xf32>
    %68 = vector.broadcast %7 : vector<1x16xf32> to vector<16x16xf32>
    %69 = arith.addf %67, %68 : vector<16x16xf32>
    %cst_35 = arith.constant dense<0xFF800000> : vector<16xf32>
    %70 = vector.multi_reduction <maximumf>, %69, %cst_35 [1] : vector<16x16xf32> to vector<16xf32>
    %71 = vector.shape_cast %70 : vector<16xf32> to vector<16x1xf32>
    %72 = vector.broadcast %71 : vector<16x1xf32> to vector<16x16xf32>
    %73 = arith.subf %69, %72 : vector<16x16xf32>
    %74 = math.exp %73 : vector<16x16xf32>
    %cst_36 = arith.constant dense<0.000000e+00> : vector<16xf32>
    %75 = vector.multi_reduction <add>, %74, %cst_36 [1] : vector<16x16xf32> to vector<16xf32>
    %76 = vector.shape_cast %75 : vector<16xf32> to vector<16x1xf32>
    %77 = tpu.reciprocal %76 {approx = true} : vector<16x1xf32> -> vector<16x1xf32>
    %78 = vector.broadcast %77 : vector<16x1xf32> to vector<16x16xf32>
    %79 = arith.mulf %74, %78 : vector<16x16xf32>
    %80 = arith.truncf %79 : vector<16x16xf32> to vector<16x16xbf16>
    %cst_37 = arith.constant dense<0.000000e+00> : vector<16x16xf32>
    %81 = tpu.matmul %80, %64, %cst_37 {dimension_numbers = #tpu.dot_dimension_numbers<[1], [0], [0], [1], [0, 0, 1, 1], [], []>} : vector<16x16xbf16>, vector<16x16xbf16>, vector<16x16xf32> -> vector<16x16xf32>
    %c0_38 = arith.constant 0 : index
    %c32_39 = arith.constant 32 : index
    %82 = vector.load %arg5[%c0_38, %c32_39] : memref<16x64xf32, #tpu.memory_space<vmem>>, vector<16x16xf32>
    tpu.vector_store %arg5[%c0_38, %c32_39], %81 {strides = array<i32>} : memref<16x64xf32, #tpu.memory_space<vmem>>, vector<16x16xf32>,
    %c0_40 = arith.constant 0 : index
    %83 = arith.index_cast %1 : i32 to index
    %c48 = arith.constant 48 : index
    %84 = vector.load %arg3[%c0_40, %83, %c48] : memref<1x16x192xbf16, #tpu.memory_space<vmem>>, vector<1x16x16xbf16>
    %85 = vector.shape_cast %84 : vector<1x16x16xbf16> to vector<16x16xbf16>
    %c0_41 = arith.constant 0 : index
    %c0_42 = arith.constant 0 : index
    %c112 = arith.constant 112 : index
    %86 = vector.load %arg3[%c0_41, %c0_42, %c112] : memref<1x16x192xbf16, #tpu.memory_space<vmem>>, vector<1x16x16xbf16>
    %87 = vector.shape_cast %86 : vector<1x16x16xbf16> to vector<16x16xbf16>
    %c0_43 = arith.constant 0 : index
    %c0_44 = arith.constant 0 : index
    %c176 = arith.constant 176 : index
    %88 = vector.load %arg3[%c0_43, %c0_44, %c176] : memref<1x16x192xbf16, #tpu.memory_space<vmem>>, vector<1x16x16xbf16>
    %89 = vector.shape_cast %88 : vector<1x16x16xbf16> to vector<16x16xbf16>
    %cst_45 = arith.constant dense<0.000000e+00> : vector<16x16xf32>
    %90 = tpu.matmul %85, %87, %cst_45 {dimension_numbers = #tpu.dot_dimension_numbers<[1], [1], [0], [0], [0, 0, 1, 0], [], []>} : vector<16x16xbf16>, vector<16x16xbf16>, vector<16x16xf32> -> vector<16x16xf32>
    %cst_46 = arith.constant 2.500000e-01 : f32
    %91 = vector.broadcast %cst_46 : f32 to vector<16x16xf32>
    %92 = arith.mulf %90, %91 : vector<16x16xf32>
    %93 = vector.broadcast %7 : vector<1x16xf32> to vector<16x16xf32>
    %94 = arith.addf %92, %93 : vector<16x16xf32>
    %cst_47 = arith.constant dense<0xFF800000> : vector<16xf32>
    %95 = vector.multi_reduction <maximumf>, %94, %cst_47 [1] : vector<16x16xf32> to vector<16xf32>
    %96 = vector.shape_cast %95 : vector<16xf32> to vector<16x1xf32>
    %97 = vector.broadcast %96 : vector<16x1xf32> to vector<16x16xf32>
    %98 = arith.subf %94, %97 : vector<16x16xf32>
    %99 = math.exp %98 : vector<16x16xf32>
    %cst_48 = arith.constant dense<0.000000e+00> : vector<16xf32>
    %100 = vector.multi_reduction <add>, %99, %cst_48 [1] : vector<16x16xf32> to vector<16xf32>
    %101 = vector.shape_cast %100 : vector<16xf32> to vector<16x1xf32>
    %102 = tpu.reciprocal %101 {approx = true} : vector<16x1xf32> -> vector<16x1xf32>
    %103 = vector.broadcast %102 : vector<16x1xf32> to vector<16x16xf32>
    %104 = arith.mulf %99, %103 : vector<16x16xf32>
    %105 = arith.truncf %104 : vector<16x16xf32> to vector<16x16xbf16>
    %cst_49 = arith.constant dense<0.000000e+00> : vector<16x16xf32>
    %106 = tpu.matmul %105, %89, %cst_49 {dimension_numbers = #tpu.dot_dimension_numbers<[1], [0], [0], [1], [0, 0, 1, 1], [], []>} : vector<16x16xbf16>, vector<16x16xbf16>, vector<16x16xf32> -> vector<16x16xf32>
    %c0_50 = arith.constant 0 : index
    %c48_51 = arith.constant 48 : index
    %107 = vector.load %arg5[%c0_50, %c48_51] : memref<16x64xf32, #tpu.memory_space<vmem>>, vector<16x16xf32>
    tpu.vector_store %arg5[%c0_50, %c48_51], %106 {strides = array<i32>} : memref<16x64xf32, #tpu.memory_space<vmem>>, vector<16x16xf32>,
    %c0_52 = arith.constant 0 : index
    %c0_53 = arith.constant 0 : index
    %108 = vector.load %arg5[%c0_52, %c0_53] : memref<16x64xf32, #tpu.memory_space<vmem>>, vector<16x64xf32>
    %109 = arith.truncf %108 : vector<16x64xf32> to vector<16x64xbf16>
    %c0_54 = arith.constant 0 : index
    %c0_55 = arith.constant 0 : index
    %c0_56 = arith.constant 0 : index
    %110 = vector.load %arg4[%c0_54, %c0_55, %c0_56] : memref<1x16x64xbf16, #tpu.memory_space<vmem>>, vector<1x16x64xbf16>
    %111 = vector.shape_cast %110 : vector<1x16x64xbf16> to vector<16x64xbf16>
    %112 = vector.shape_cast %109 : vector<16x64xbf16> to vector<1x16x64xbf16>
    tpu.vector_store %arg4[%c0_54, %c0_55, %c0_56], %112 {strides = array<i32>} : memref<1x16x64xbf16, #tpu.memory_space<vmem>>, vector<1x16x64xbf16>,
    return
  }
  func.func @transform_0(%arg0: i32, %arg1: i32) -> (i32, i32, i32) {
    %c0_i32 = arith.constant 0 : i32
    %c0_i32_0 = arith.constant 0 : i32
    %c0_i32_1 = arith.constant 0 : i32
    return %arg0, %c0_i32, %c0_i32_0 : i32, i32, i32
  }
  func.func @transform_1(%arg0: i32, %arg1: i32) -> (i32, i32, i32) {
    %c0_i32 = arith.constant 0 : i32
    %c0_i32_0 = arith.constant 0 : i32
    %c0_i32_1 = arith.constant 0 : i32
    return %arg0, %c0_i32, %c0_i32_0 : i32, i32, i32
  }
  func.func @transform_2(%arg0: i32, %arg1: i32) -> (i32, i32, i32) {
    %c0_i32 = arith.constant 0 : i32
    %c0_i32_0 = arith.constant 0 : i32
    return %arg0, %arg1, %c0_i32 : i32, i32, i32
  }
}

module attributes {stable_mosaic.version = 11 : i64} {
  func.func @_dense_res_ln_kernel(%arg0: i32, %arg1: i32, %arg2: memref<32x64xbf16, #tpu.memory_space<vmem>>, %arg3: memref<64x64xbf16, #tpu.memory_space<vmem>>, %arg4: memref<1x64xf32, #tpu.memory_space<vmem>>, %arg5: memref<32x64xbf16, #tpu.memory_space<vmem>>, %arg6: memref<1x64xf32, #tpu.memory_space<vmem>>, %arg7: memref<1x64xf32, #tpu.memory_space<vmem>>, %arg8: memref<32x64xbf16, #tpu.memory_space<vmem>>, %arg9: memref<32x64xf32, #tpu.memory_space<vmem>>) attributes {dimension_semantics = [#tpu.dimension_semantics<parallel>, #tpu.dimension_semantics<arbitrary>], iteration_bounds = array<i64: 1, 1>, scalar_prefetch = 0 : i64, scratch_operands = 1 : i64, tpu.core_type = #tpu.core_type<tc>, window_params = [{transform_indices = @transform_0, window_bounds = array<i64: 32, 64>}, {transform_indices = @transform_1, window_bounds = array<i64: 64, 64>}, {pipeline_mode = #tpu.pipeline_mode<synchronous>, transform_indices = @transform_2, window_bounds = array<i64: 1, 64>}, {transform_indices = @transform_3, window_bounds = array<i64: 32, 64>}, {pipeline_mode = #tpu.pipeline_mode<synchronous>, transform_indices = @transform_4, window_bounds = array<i64: 1, 64>}, {pipeline_mode = #tpu.pipeline_mode<synchronous>, transform_indices = @transform_5, window_bounds = array<i64: 1, 64>}, {transform_indices = @transform_6, window_bounds = array<i64: 32, 64>}]} {
    %c0_i32 = arith.constant 0 : i32
    %0 = arith.cmpi eq, %arg1, %c0_i32 : i32
    %1 = arith.extui %0 : i1 to i32
    %c0_i32_0 = arith.constant 0 : i32
    %2 = arith.cmpi ne, %1, %c0_i32_0 : i32
    scf.if %2 {
      %cst_10 = arith.constant 0.000000e+00 : f32
      %12 = vector.broadcast %cst_10 : f32 to vector<32x64xf32>
      %c0_11 = arith.constant 0 : index
      %c0_12 = arith.constant 0 : index
      %13 = vector.load %arg9[%c0_11, %c0_12] : memref<32x64xf32, #tpu.memory_space<vmem>>, vector<32x64xf32>
      tpu.vector_store %arg9[%c0_11, %c0_12], %12 {strides = array<i32>} : memref<32x64xf32, #tpu.memory_space<vmem>>, vector<32x64xf32>,
    } else {
    }
    %c0 = arith.constant 0 : index
    %c0_1 = arith.constant 0 : index
    %3 = vector.load %arg9[%c0, %c0_1] : memref<32x64xf32, #tpu.memory_space<vmem>>, vector<32x64xf32>
    %c0_2 = arith.constant 0 : index
    %c0_3 = arith.constant 0 : index
    %4 = vector.load %arg2[%c0_2, %c0_3] : memref<32x64xbf16, #tpu.memory_space<vmem>>, vector<32x64xbf16>
    %c0_4 = arith.constant 0 : index
    %c0_5 = arith.constant 0 : index
    %5 = vector.load %arg3[%c0_4, %c0_5] : memref<64x64xbf16, #tpu.memory_space<vmem>>, vector<64x64xbf16>
    %cst = arith.constant dense<0.000000e+00> : vector<32x64xf32>
    %6 = tpu.matmul %4, %5, %cst {dimension_numbers = #tpu.dot_dimension_numbers<[1], [0], [0], [1], [0, 0, 1, 1], [], []>} : vector<32x64xbf16>, vector<64x64xbf16>, vector<32x64xf32> -> vector<32x64xf32>
    %7 = arith.addf %3, %6 : vector<32x64xf32>
    %c0_6 = arith.constant 0 : index
    %c0_7 = arith.constant 0 : index
    %8 = vector.load %arg9[%c0_6, %c0_7] : memref<32x64xf32, #tpu.memory_space<vmem>>, vector<32x64xf32>
    tpu.vector_store %arg9[%c0_6, %c0_7], %7 {strides = array<i32>} : memref<32x64xf32, #tpu.memory_space<vmem>>, vector<32x64xf32>,
    %c0_i32_8 = arith.constant 0 : i32
    %9 = arith.cmpi eq, %arg1, %c0_i32_8 : i32
    %10 = arith.extui %9 : i1 to i32
    %c0_i32_9 = arith.constant 0 : i32
    %11 = arith.cmpi ne, %10, %c0_i32_9 : i32
    scf.if %11 {
      %c0_10 = arith.constant 0 : index
      %c0_11 = arith.constant 0 : index
      %12 = vector.load %arg9[%c0_10, %c0_11] : memref<32x64xf32, #tpu.memory_space<vmem>>, vector<32x64xf32>
      %c0_12 = arith.constant 0 : index
      %c0_13 = arith.constant 0 : index
      %13 = vector.load %arg4[%c0_12, %c0_13] : memref<1x64xf32, #tpu.memory_space<vmem>>, vector<1x64xf32>
      %14 = vector.broadcast %13 : vector<1x64xf32> to vector<32x64xf32>
      %15 = arith.addf %12, %14 : vector<32x64xf32>
      %c0_14 = arith.constant 0 : index
      %c0_15 = arith.constant 0 : index
      %16 = vector.load %arg5[%c0_14, %c0_15] : memref<32x64xbf16, #tpu.memory_space<vmem>>, vector<32x64xbf16>
      %17 = arith.extf %16 : vector<32x64xbf16> to vector<32x64xf32>
      %18 = arith.addf %15, %17 : vector<32x64xf32>
      %cst_16 = arith.constant dense<0.000000e+00> : vector<32xf32>
      %19 = vector.multi_reduction <add>, %18, %cst_16 [1] : vector<32x64xf32> to vector<32xf32>
      %20 = vector.shape_cast %19 : vector<32xf32> to vector<32x1xf32>
      %cst_17 = arith.constant 6.400000e+01 : f32
      %21 = vector.broadcast %cst_17 : f32 to vector<32x1xf32>
      %22 = arith.divf %20, %21 : vector<32x1xf32>
      %23 = vector.broadcast %22 : vector<32x1xf32> to vector<32x64xf32>
      %24 = arith.subf %18, %23 : vector<32x64xf32>
      %25 = arith.mulf %24, %24 : vector<32x64xf32>
      %cst_18 = arith.constant dense<0.000000e+00> : vector<32xf32>
      %26 = vector.multi_reduction <add>, %25, %cst_18 [1] : vector<32x64xf32> to vector<32xf32>
      %27 = vector.shape_cast %26 : vector<32xf32> to vector<32x1xf32>
      %cst_19 = arith.constant 6.400000e+01 : f32
      %28 = vector.broadcast %cst_19 : f32 to vector<32x1xf32>
      %29 = arith.divf %27, %28 : vector<32x1xf32>
      %cst_20 = arith.constant 9.99999996E-13 : f32
      %30 = vector.broadcast %cst_20 : f32 to vector<32x1xf32>
      %31 = arith.addf %29, %30 : vector<32x1xf32>
      %32 = math.rsqrt %31 : vector<32x1xf32>
      %33 = vector.broadcast %22 : vector<32x1xf32> to vector<32x64xf32>
      %34 = arith.subf %18, %33 : vector<32x64xf32>
      %35 = vector.broadcast %32 : vector<32x1xf32> to vector<32x64xf32>
      %36 = arith.mulf %34, %35 : vector<32x64xf32>
      %c0_21 = arith.constant 0 : index
      %c0_22 = arith.constant 0 : index
      %37 = vector.load %arg6[%c0_21, %c0_22] : memref<1x64xf32, #tpu.memory_space<vmem>>, vector<1x64xf32>
      %38 = vector.broadcast %37 : vector<1x64xf32> to vector<32x64xf32>
      %39 = arith.mulf %36, %38 : vector<32x64xf32>
      %c0_23 = arith.constant 0 : index
      %c0_24 = arith.constant 0 : index
      %40 = vector.load %arg7[%c0_23, %c0_24] : memref<1x64xf32, #tpu.memory_space<vmem>>, vector<1x64xf32>
      %41 = vector.broadcast %40 : vector<1x64xf32> to vector<32x64xf32>
      %42 = arith.addf %39, %41 : vector<32x64xf32>
      %43 = arith.truncf %42 : vector<32x64xf32> to vector<32x64xbf16>
      %c0_25 = arith.constant 0 : index
      %c0_26 = arith.constant 0 : index
      %44 = vector.load %arg8[%c0_25, %c0_26] : memref<32x64xbf16, #tpu.memory_space<vmem>>, vector<32x64xbf16>
      tpu.vector_store %arg8[%c0_25, %c0_26], %43 {strides = array<i32>} : memref<32x64xbf16, #tpu.memory_space<vmem>>, vector<32x64xbf16>,
    } else {
    }
    return
  }
  func.func @transform_0(%arg0: i32, %arg1: i32) -> (i32, i32) {
    %c0_i32 = arith.constant 0 : i32
    return %arg0, %arg1 : i32, i32
  }
  func.func @transform_1(%arg0: i32, %arg1: i32) -> (i32, i32) {
    %c0_i32 = arith.constant 0 : i32
    %c0_i32_0 = arith.constant 0 : i32
    return %arg1, %c0_i32 : i32, i32
  }
  func.func @transform_2(%arg0: i32, %arg1: i32) -> (i32, i32) {
    %c0_i32 = arith.constant 0 : i32
    %c0_i32_0 = arith.constant 0 : i32
    %c0_i32_1 = arith.constant 0 : i32
    return %c0_i32, %c0_i32_0 : i32, i32
  }
  func.func @transform_3(%arg0: i32, %arg1: i32) -> (i32, i32) {
    %c0_i32 = arith.constant 0 : i32
    %c0_i32_0 = arith.constant 0 : i32
    return %arg0, %c0_i32 : i32, i32
  }
  func.func @transform_4(%arg0: i32, %arg1: i32) -> (i32, i32) {
    %c0_i32 = arith.constant 0 : i32
    %c0_i32_0 = arith.constant 0 : i32
    %c0_i32_1 = arith.constant 0 : i32
    return %c0_i32, %c0_i32_0 : i32, i32
  }
  func.func @transform_5(%arg0: i32, %arg1: i32) -> (i32, i32) {
    %c0_i32 = arith.constant 0 : i32
    %c0_i32_0 = arith.constant 0 : i32
    %c0_i32_1 = arith.constant 0 : i32
    return %c0_i32, %c0_i32_0 : i32, i32
  }
  func.func @transform_6(%arg0: i32, %arg1: i32) -> (i32, i32) {
    %c0_i32 = arith.constant 0 : i32
    %c0_i32_0 = arith.constant 0 : i32
    return %arg0, %c0_i32 : i32, i32
  }
}

module attributes {stable_mosaic.version = 11 : i64} {
  func.func @_dense_kernel(%arg0: i32, %arg1: i32, %arg2: i32, %arg3: memref<32x64xbf16, #tpu.memory_space<vmem>>, %arg4: memref<64x128xbf16, #tpu.memory_space<vmem>>, %arg5: memref<1x128xf32, #tpu.memory_space<vmem>>, %arg6: memref<32x128xbf16, #tpu.memory_space<vmem>>, %arg7: memref<32x128xf32, #tpu.memory_space<vmem>>) attributes {dimension_semantics = [#tpu.dimension_semantics<parallel>, #tpu.dimension_semantics<parallel>, #tpu.dimension_semantics<arbitrary>], iteration_bounds = array<i64: 1, 1, 1>, scalar_prefetch = 0 : i64, scratch_operands = 1 : i64, tpu.core_type = #tpu.core_type<tc>, window_params = [{transform_indices = @transform_0, window_bounds = array<i64: 32, 64>}, {transform_indices = @transform_1, window_bounds = array<i64: 64, 128>}, {transform_indices = @transform_2, window_bounds = array<i64: 1, 128>}, {transform_indices = @transform_3, window_bounds = array<i64: 32, 128>}]} {
    %c0_i32 = arith.constant 0 : i32
    %0 = arith.cmpi eq, %arg2, %c0_i32 : i32
    %1 = arith.extui %0 : i1 to i32
    %c0_i32_0 = arith.constant 0 : i32
    %2 = arith.cmpi ne, %1, %c0_i32_0 : i32
    scf.if %2 {
      %cst_10 = arith.constant 0.000000e+00 : f32
      %12 = vector.broadcast %cst_10 : f32 to vector<32x128xf32>
      %c0_11 = arith.constant 0 : index
      %c0_12 = arith.constant 0 : index
      %13 = vector.load %arg7[%c0_11, %c0_12] : memref<32x128xf32, #tpu.memory_space<vmem>>, vector<32x128xf32>
      tpu.vector_store %arg7[%c0_11, %c0_12], %12 {strides = array<i32>} : memref<32x128xf32, #tpu.memory_space<vmem>>, vector<32x128xf32>,
    } else {
    }
    %c0 = arith.constant 0 : index
    %c0_1 = arith.constant 0 : index
    %3 = vector.load %arg7[%c0, %c0_1] : memref<32x128xf32, #tpu.memory_space<vmem>>, vector<32x128xf32>
    %c0_2 = arith.constant 0 : index
    %c0_3 = arith.constant 0 : index
    %4 = vector.load %arg3[%c0_2, %c0_3] : memref<32x64xbf16, #tpu.memory_space<vmem>>, vector<32x64xbf16>
    %c0_4 = arith.constant 0 : index
    %c0_5 = arith.constant 0 : index
    %5 = vector.load %arg4[%c0_4, %c0_5] : memref<64x128xbf16, #tpu.memory_space<vmem>>, vector<64x128xbf16>
    %cst = arith.constant dense<0.000000e+00> : vector<32x128xf32>
    %6 = tpu.matmul %4, %5, %cst {dimension_numbers = #tpu.dot_dimension_numbers<[1], [0], [0], [1], [0, 0, 1, 1], [], []>} : vector<32x64xbf16>, vector<64x128xbf16>, vector<32x128xf32> -> vector<32x128xf32>
    %7 = arith.addf %3, %6 : vector<32x128xf32>
    %c0_6 = arith.constant 0 : index
    %c0_7 = arith.constant 0 : index
    %8 = vector.load %arg7[%c0_6, %c0_7] : memref<32x128xf32, #tpu.memory_space<vmem>>, vector<32x128xf32>
    tpu.vector_store %arg7[%c0_6, %c0_7], %7 {strides = array<i32>} : memref<32x128xf32, #tpu.memory_space<vmem>>, vector<32x128xf32>,
    %c0_i32_8 = arith.constant 0 : i32
    %9 = arith.cmpi eq, %arg2, %c0_i32_8 : i32
    %10 = arith.extui %9 : i1 to i32
    %c0_i32_9 = arith.constant 0 : i32
    %11 = arith.cmpi ne, %10, %c0_i32_9 : i32
    scf.if %11 {
      %c0_10 = arith.constant 0 : index
      %c0_11 = arith.constant 0 : index
      %12 = vector.load %arg7[%c0_10, %c0_11] : memref<32x128xf32, #tpu.memory_space<vmem>>, vector<32x128xf32>
      %c0_12 = arith.constant 0 : index
      %c0_13 = arith.constant 0 : index
      %13 = vector.load %arg5[%c0_12, %c0_13] : memref<1x128xf32, #tpu.memory_space<vmem>>, vector<1x128xf32>
      %14 = vector.broadcast %13 : vector<1x128xf32> to vector<32x128xf32>
      %15 = arith.addf %12, %14 : vector<32x128xf32>
      %cst_14 = arith.constant 5.000000e-01 : f32
      %16 = vector.broadcast %cst_14 : f32 to vector<32x128xf32>
      %17 = arith.mulf %16, %15 : vector<32x128xf32>
      %cst_15 = arith.constant 4.471500e-02 : f32
      %18 = vector.broadcast %cst_15 : f32 to vector<32x128xf32>
      %19 = arith.mulf %18, %15 : vector<32x128xf32>
      %20 = arith.mulf %19, %15 : vector<32x128xf32>
      %21 = arith.mulf %20, %15 : vector<32x128xf32>
      %22 = arith.addf %15, %21 : vector<32x128xf32>
      %cst_16 = arith.constant 0.797884583 : f32
      %23 = vector.broadcast %cst_16 : f32 to vector<32x128xf32>
      %24 = arith.mulf %23, %22 : vector<32x128xf32>
      %25 = math.tanh %24 : vector<32x128xf32>
      %cst_17 = arith.constant 1.000000e+00 : f32
      %26 = vector.broadcast %cst_17 : f32 to vector<32x128xf32>
      %27 = arith.addf %26, %25 : vector<32x128xf32>
      %28 = arith.mulf %17, %27 : vector<32x128xf32>
      %29 = arith.truncf %28 : vector<32x128xf32> to vector<32x128xbf16>
      %c0_18 = arith.constant 0 : index
      %c0_19 = arith.constant 0 : index
      %30 = vector.load %arg6[%c0_18, %c0_19] : memref<32x128xbf16, #tpu.memory_space<vmem>>, vector<32x128xbf16>
      tpu.vector_store %arg6[%c0_18, %c0_19], %29 {strides = array<i32>} : memref<32x128xbf16, #tpu.memory_space<vmem>>, vector<32x128xbf16>,
    } else {
    }
    return
  }
  func.func @transform_0(%arg0: i32, %arg1: i32, %arg2: i32) -> (i32, i32) {
    %c0_i32 = arith.constant 0 : i32
    return %arg0, %arg2 : i32, i32
  }
  func.func @transform_1(%arg0: i32, %arg1: i32, %arg2: i32) -> (i32, i32) {
    %c0_i32 = arith.constant 0 : i32
    return %arg2, %arg1 : i32, i32
  }
  func.func @transform_2(%arg0: i32, %arg1: i32, %arg2: i32) -> (i32, i32) {
    %c0_i32 = arith.constant 0 : i32
    %c0_i32_0 = arith.constant 0 : i32
    return %c0_i32, %arg1 : i32, i32
  }
  func.func @transform_3(%arg0: i32, %arg1: i32, %arg2: i32) -> (i32, i32) {
    %c0_i32 = arith.constant 0 : i32
    return %arg0, %arg1 : i32, i32
  }
}

module attributes {stable_mosaic.version = 11 : i64} {
  func.func @_dense_res_ln_kernel(%arg0: i32, %arg1: i32, %arg2: memref<32x128xbf16, #tpu.memory_space<vmem>>, %arg3: memref<128x64xbf16, #tpu.memory_space<vmem>>, %arg4: memref<1x64xf32, #tpu.memory_space<vmem>>, %arg5: memref<32x64xbf16, #tpu.memory_space<vmem>>, %arg6: memref<1x64xf32, #tpu.memory_space<vmem>>, %arg7: memref<1x64xf32, #tpu.memory_space<vmem>>, %arg8: memref<32x64xbf16, #tpu.memory_space<vmem>>, %arg9: memref<32x64xf32, #tpu.memory_space<vmem>>) attributes {dimension_semantics = [#tpu.dimension_semantics<parallel>, #tpu.dimension_semantics<arbitrary>], iteration_bounds = array<i64: 1, 1>, scalar_prefetch = 0 : i64, scratch_operands = 1 : i64, tpu.core_type = #tpu.core_type<tc>, window_params = [{transform_indices = @transform_0, window_bounds = array<i64: 32, 128>}, {transform_indices = @transform_1, window_bounds = array<i64: 128, 64>}, {pipeline_mode = #tpu.pipeline_mode<synchronous>, transform_indices = @transform_2, window_bounds = array<i64: 1, 64>}, {transform_indices = @transform_3, window_bounds = array<i64: 32, 64>}, {pipeline_mode = #tpu.pipeline_mode<synchronous>, transform_indices = @transform_4, window_bounds = array<i64: 1, 64>}, {pipeline_mode = #tpu.pipeline_mode<synchronous>, transform_indices = @transform_5, window_bounds = array<i64: 1, 64>}, {transform_indices = @transform_6, window_bounds = array<i64: 32, 64>}]} {
    %c0_i32 = arith.constant 0 : i32
    %0 = arith.cmpi eq, %arg1, %c0_i32 : i32
    %1 = arith.extui %0 : i1 to i32
    %c0_i32_0 = arith.constant 0 : i32
    %2 = arith.cmpi ne, %1, %c0_i32_0 : i32
    scf.if %2 {
      %cst_10 = arith.constant 0.000000e+00 : f32
      %12 = vector.broadcast %cst_10 : f32 to vector<32x64xf32>
      %c0_11 = arith.constant 0 : index
      %c0_12 = arith.constant 0 : index
      %13 = vector.load %arg9[%c0_11, %c0_12] : memref<32x64xf32, #tpu.memory_space<vmem>>, vector<32x64xf32>
      tpu.vector_store %arg9[%c0_11, %c0_12], %12 {strides = array<i32>} : memref<32x64xf32, #tpu.memory_space<vmem>>, vector<32x64xf32>,
    } else {
    }
    %c0 = arith.constant 0 : index
    %c0_1 = arith.constant 0 : index
    %3 = vector.load %arg9[%c0, %c0_1] : memref<32x64xf32, #tpu.memory_space<vmem>>, vector<32x64xf32>
    %c0_2 = arith.constant 0 : index
    %c0_3 = arith.constant 0 : index
    %4 = vector.load %arg2[%c0_2, %c0_3] : memref<32x128xbf16, #tpu.memory_space<vmem>>, vector<32x128xbf16>
    %c0_4 = arith.constant 0 : index
    %c0_5 = arith.constant 0 : index
    %5 = vector.load %arg3[%c0_4, %c0_5] : memref<128x64xbf16, #tpu.memory_space<vmem>>, vector<128x64xbf16>
    %cst = arith.constant dense<0.000000e+00> : vector<32x64xf32>
    %6 = tpu.matmul %4, %5, %cst {dimension_numbers = #tpu.dot_dimension_numbers<[1], [0], [0], [1], [0, 0, 1, 1], [], []>} : vector<32x128xbf16>, vector<128x64xbf16>, vector<32x64xf32> -> vector<32x64xf32>
    %7 = arith.addf %3, %6 : vector<32x64xf32>
    %c0_6 = arith.constant 0 : index
    %c0_7 = arith.constant 0 : index
    %8 = vector.load %arg9[%c0_6, %c0_7] : memref<32x64xf32, #tpu.memory_space<vmem>>, vector<32x64xf32>
    tpu.vector_store %arg9[%c0_6, %c0_7], %7 {strides = array<i32>} : memref<32x64xf32, #tpu.memory_space<vmem>>, vector<32x64xf32>,
    %c0_i32_8 = arith.constant 0 : i32
    %9 = arith.cmpi eq, %arg1, %c0_i32_8 : i32
    %10 = arith.extui %9 : i1 to i32
    %c0_i32_9 = arith.constant 0 : i32
    %11 = arith.cmpi ne, %10, %c0_i32_9 : i32
    scf.if %11 {
      %c0_10 = arith.constant 0 : index
      %c0_11 = arith.constant 0 : index
      %12 = vector.load %arg9[%c0_10, %c0_11] : memref<32x64xf32, #tpu.memory_space<vmem>>, vector<32x64xf32>
      %c0_12 = arith.constant 0 : index
      %c0_13 = arith.constant 0 : index
      %13 = vector.load %arg4[%c0_12, %c0_13] : memref<1x64xf32, #tpu.memory_space<vmem>>, vector<1x64xf32>
      %14 = vector.broadcast %13 : vector<1x64xf32> to vector<32x64xf32>
      %15 = arith.addf %12, %14 : vector<32x64xf32>
      %c0_14 = arith.constant 0 : index
      %c0_15 = arith.constant 0 : index
      %16 = vector.load %arg5[%c0_14, %c0_15] : memref<32x64xbf16, #tpu.memory_space<vmem>>, vector<32x64xbf16>
      %17 = arith.extf %16 : vector<32x64xbf16> to vector<32x64xf32>
      %18 = arith.addf %15, %17 : vector<32x64xf32>
      %cst_16 = arith.constant dense<0.000000e+00> : vector<32xf32>
      %19 = vector.multi_reduction <add>, %18, %cst_16 [1] : vector<32x64xf32> to vector<32xf32>
      %20 = vector.shape_cast %19 : vector<32xf32> to vector<32x1xf32>
      %cst_17 = arith.constant 6.400000e+01 : f32
      %21 = vector.broadcast %cst_17 : f32 to vector<32x1xf32>
      %22 = arith.divf %20, %21 : vector<32x1xf32>
      %23 = vector.broadcast %22 : vector<32x1xf32> to vector<32x64xf32>
      %24 = arith.subf %18, %23 : vector<32x64xf32>
      %25 = arith.mulf %24, %24 : vector<32x64xf32>
      %cst_18 = arith.constant dense<0.000000e+00> : vector<32xf32>
      %26 = vector.multi_reduction <add>, %25, %cst_18 [1] : vector<32x64xf32> to vector<32xf32>
      %27 = vector.shape_cast %26 : vector<32xf32> to vector<32x1xf32>
      %cst_19 = arith.constant 6.400000e+01 : f32
      %28 = vector.broadcast %cst_19 : f32 to vector<32x1xf32>
      %29 = arith.divf %27, %28 : vector<32x1xf32>
      %cst_20 = arith.constant 9.99999996E-13 : f32
      %30 = vector.broadcast %cst_20 : f32 to vector<32x1xf32>
      %31 = arith.addf %29, %30 : vector<32x1xf32>
      %32 = math.rsqrt %31 : vector<32x1xf32>
      %33 = vector.broadcast %22 : vector<32x1xf32> to vector<32x64xf32>
      %34 = arith.subf %18, %33 : vector<32x64xf32>
      %35 = vector.broadcast %32 : vector<32x1xf32> to vector<32x64xf32>
      %36 = arith.mulf %34, %35 : vector<32x64xf32>
      %c0_21 = arith.constant 0 : index
      %c0_22 = arith.constant 0 : index
      %37 = vector.load %arg6[%c0_21, %c0_22] : memref<1x64xf32, #tpu.memory_space<vmem>>, vector<1x64xf32>
      %38 = vector.broadcast %37 : vector<1x64xf32> to vector<32x64xf32>
      %39 = arith.mulf %36, %38 : vector<32x64xf32>
      %c0_23 = arith.constant 0 : index
      %c0_24 = arith.constant 0 : index
      %40 = vector.load %arg7[%c0_23, %c0_24] : memref<1x64xf32, #tpu.memory_space<vmem>>, vector<1x64xf32>
      %41 = vector.broadcast %40 : vector<1x64xf32> to vector<32x64xf32>
      %42 = arith.addf %39, %41 : vector<32x64xf32>
      %43 = arith.truncf %42 : vector<32x64xf32> to vector<32x64xbf16>
      %c0_25 = arith.constant 0 : index
      %c0_26 = arith.constant 0 : index
      %44 = vector.load %arg8[%c0_25, %c0_26] : memref<32x64xbf16, #tpu.memory_space<vmem>>, vector<32x64xbf16>
      tpu.vector_store %arg8[%c0_25, %c0_26], %43 {strides = array<i32>} : memref<32x64xbf16, #tpu.memory_space<vmem>>, vector<32x64xbf16>,
    } else {
    }
    return
  }
  func.func @transform_0(%arg0: i32, %arg1: i32) -> (i32, i32) {
    %c0_i32 = arith.constant 0 : i32
    return %arg0, %arg1 : i32, i32
  }
  func.func @transform_1(%arg0: i32, %arg1: i32) -> (i32, i32) {
    %c0_i32 = arith.constant 0 : i32
    %c0_i32_0 = arith.constant 0 : i32
    return %arg1, %c0_i32 : i32, i32
  }
  func.func @transform_2(%arg0: i32, %arg1: i32) -> (i32, i32) {
    %c0_i32 = arith.constant 0 : i32
    %c0_i32_0 = arith.constant 0 : i32
    %c0_i32_1 = arith.constant 0 : i32
    return %c0_i32, %c0_i32_0 : i32, i32
  }
  func.func @transform_3(%arg0: i32, %arg1: i32) -> (i32, i32) {
    %c0_i32 = arith.constant 0 : i32
    %c0_i32_0 = arith.constant 0 : i32
    return %arg0, %c0_i32 : i32, i32
  }
  func.func @transform_4(%arg0: i32, %arg1: i32) -> (i32, i32) {
    %c0_i32 = arith.constant 0 : i32
    %c0_i32_0 = arith.constant 0 : i32
    %c0_i32_1 = arith.constant 0 : i32
    return %c0_i32, %c0_i32_0 : i32, i32
  }
  func.func @transform_5(%arg0: i32, %arg1: i32) -> (i32, i32) {
    %c0_i32 = arith.constant 0 : i32
    %c0_i32_0 = arith.constant 0 : i32
    %c0_i32_1 = arith.constant 0 : i32
    return %c0_i32, %c0_i32_0 : i32, i32
  }
  func.func @transform_6(%arg0: i32, %arg1: i32) -> (i32, i32) {
    %c0_i32 = arith.constant 0 : i32
    %c0_i32_0 = arith.constant 0 : i32
    return %arg0, %c0_i32 : i32, i32
  }
}

module attributes {stable_mosaic.version = 11 : i64} {
  func.func @_pooler_cls_kernel(%arg0: i32, %arg1: memref<2x64xbf16, #tpu.memory_space<vmem>>, %arg2: memref<64x64xbf16, #tpu.memory_space<vmem>>, %arg3: memref<1x64xf32, #tpu.memory_space<vmem>>, %arg4: memref<64x128xbf16, #tpu.memory_space<vmem>>, %arg5: memref<1x128xf32, #tpu.memory_space<vmem>>, %arg6: memref<2x128xf32, #tpu.memory_space<vmem>>) attributes {dimension_semantics = [#tpu.dimension_semantics<arbitrary>], iteration_bounds = array<i64: 1>, scalar_prefetch = 0 : i64, scratch_operands = 0 : i64, tpu.core_type = #tpu.core_type<tc>, window_params = [{pipeline_mode = #tpu.pipeline_mode<synchronous>, transform_indices = @transform_0, window_bounds = array<i64: 2, 64>}, {pipeline_mode = #tpu.pipeline_mode<synchronous>, transform_indices = @transform_1, window_bounds = array<i64: 64, 64>}, {pipeline_mode = #tpu.pipeline_mode<synchronous>, transform_indices = @transform_2, window_bounds = array<i64: 1, 64>}, {pipeline_mode = #tpu.pipeline_mode<synchronous>, transform_indices = @transform_3, window_bounds = array<i64: 64, 128>}, {pipeline_mode = #tpu.pipeline_mode<synchronous>, transform_indices = @transform_4, window_bounds = array<i64: 1, 128>}, {pipeline_mode = #tpu.pipeline_mode<synchronous>, transform_indices = @transform_5, window_bounds = array<i64: 2, 128>}]} {
    %c0 = arith.constant 0 : index
    %c0_0 = arith.constant 0 : index
    %0 = vector.load %arg1[%c0, %c0_0] : memref<2x64xbf16, #tpu.memory_space<vmem>>, vector<2x64xbf16>
    %c0_1 = arith.constant 0 : index
    %c0_2 = arith.constant 0 : index
    %1 = vector.load %arg2[%c0_1, %c0_2] : memref<64x64xbf16, #tpu.memory_space<vmem>>, vector<64x64xbf16>
    %cst = arith.constant dense<0.000000e+00> : vector<2x64xf32>
    %2 = tpu.matmul %0, %1, %cst {dimension_numbers = #tpu.dot_dimension_numbers<[1], [0], [0], [1], [0, 0, 1, 1], [], []>} : vector<2x64xbf16>, vector<64x64xbf16>, vector<2x64xf32> -> vector<2x64xf32>
    %c0_3 = arith.constant 0 : index
    %c0_4 = arith.constant 0 : index
    %3 = vector.load %arg3[%c0_3, %c0_4] : memref<1x64xf32, #tpu.memory_space<vmem>>, vector<1x64xf32>
    %4 = vector.broadcast %3 : vector<1x64xf32> to vector<2x64xf32>
    %5 = arith.addf %2, %4 : vector<2x64xf32>
    %6 = math.tanh %5 : vector<2x64xf32>
    %7 = arith.truncf %6 : vector<2x64xf32> to vector<2x64xbf16>
    %c0_5 = arith.constant 0 : index
    %c0_6 = arith.constant 0 : index
    %8 = vector.load %arg4[%c0_5, %c0_6] : memref<64x128xbf16, #tpu.memory_space<vmem>>, vector<64x128xbf16>
    %cst_7 = arith.constant dense<0.000000e+00> : vector<2x128xf32>
    %9 = tpu.matmul %7, %8, %cst_7 {dimension_numbers = #tpu.dot_dimension_numbers<[1], [0], [0], [1], [0, 0, 1, 1], [], []>} : vector<2x64xbf16>, vector<64x128xbf16>, vector<2x128xf32> -> vector<2x128xf32>
    %c0_8 = arith.constant 0 : index
    %c0_9 = arith.constant 0 : index
    %10 = vector.load %arg5[%c0_8, %c0_9] : memref<1x128xf32, #tpu.memory_space<vmem>>, vector<1x128xf32>
    %11 = vector.broadcast %10 : vector<1x128xf32> to vector<2x128xf32>
    %12 = arith.addf %9, %11 : vector<2x128xf32>
    %c0_10 = arith.constant 0 : index
    %c0_11 = arith.constant 0 : index
    %13 = vector.load %arg6[%c0_10, %c0_11] : memref<2x128xf32, #tpu.memory_space<vmem>>, vector<2x128xf32>
    tpu.vector_store %arg6[%c0_10, %c0_11], %12 {strides = array<i32>} : memref<2x128xf32, #tpu.memory_space<vmem>>, vector<2x128xf32>,
    return
  }
  func.func @transform_0(%arg0: i32) -> (i32, i32) {
    %c0_i32 = arith.constant 0 : i32
    %c0_i32_0 = arith.constant 0 : i32
    %c0_i32_1 = arith.constant 0 : i32
    return %c0_i32, %c0_i32_0 : i32, i32
  }
  func.func @transform_1(%arg0: i32) -> (i32, i32) {
    %c0_i32 = arith.constant 0 : i32
    %c0_i32_0 = arith.constant 0 : i32
    %c0_i32_1 = arith.constant 0 : i32
    return %c0_i32, %c0_i32_0 : i32, i32
  }
  func.func @transform_2(%arg0: i32) -> (i32, i32) {
    %c0_i32 = arith.constant 0 : i32
    %c0_i32_0 = arith.constant 0 : i32
    %c0_i32_1 = arith.constant 0 : i32
    return %c0_i32, %c0_i32_0 : i32, i32
  }
  func.func @transform_3(%arg0: i32) -> (i32, i32) {
    %c0_i32 = arith.constant 0 : i32
    %c0_i32_0 = arith.constant 0 : i32
    %c0_i32_1 = arith.constant 0 : i32
    return %c0_i32, %c0_i32_0 : i32, i32
  }
  func.func @transform_4(%arg0: i32) -> (i32, i32) {
    %c0_i32 = arith.constant 0 : i32
    %c0_i32_0 = arith.constant 0 : i32
    %c0_i32_1 = arith.constant 0 : i32
    return %c0_i32, %c0_i32_0 : i32, i32
  }
  func.func @transform_5(%arg0: i32) -> (i32, i32) {
    %c0_i32 = arith.constant 0 : i32
    %c0_i32_0 = arith.constant 0 : i32
    %c0_i32_1 = arith.constant 0 : i32
    return %c0_i32, %c0_i32_0 : i32, i32
  }
}

</mosaic_0001>

<bundles_post_ra>
// kernel: next_sentence_prediction_forward.12
= control target key start
LH: loop header
LB: loop body
LE: loop exit
PB: predicated region body
PF: predicated region fallthrough
CT: control target
= control target key end

     0   :  { %vm22_vm0 = vcmask 523264   ;;  %vm114_vm1 = vcmask 519168   ;;  %s206_s0 = inlined_call_operand.vmem [shape: bf16[32,64], index: 0, kind: input, shape index: {}]   ;;  %s207_s1 = inlined_call_operand.vmem [shape: f32[1,64], index: 1, kind: input, shape index: {}]   ;;  %s208_s2 = inlined_call_operand.vmem [shape: f32[1,64], index: 2, kind: input, shape index: {}]   ;;  %s209_s3 = inlined_call_operand.vmem [shape: bf16[32,64], index: 3, kind: output, shape index: {}]  }
   0x1   :  { %v134_v0 = vld [vmem:[%s206_s0] sm:$0xff]   ;;  %v141_v1 = vld [vmem:[%s206_s0 + $0x8] sm:$0xff]  }
   0x2   :  { %v135_v2 = vunpack.c.l.bf16 %v134_v0  ;;  %v139_v3 = vunpack.c.l.bf16 %v141_v1  ;;  %v136_v4 = vunpack.c.h.bf16 %v134_v0  ;;  %v140_v5 = vunpack.c.h.bf16 %v141_v1  ;;  %v123_v43 = vld [vmem:[%s207_s1] ss:$0 sm:$0xff] }
   0x3   :  { %v124_v45 = vld [vmem:[%s208_s2] ss:$0 sm:$0xff] }
   0x4   :  { %v23_v6 = vsel %vm22_vm0, %v135_v2, 0.0  ;;  %v29_v7 = vsel %vm22_vm0, %v139_v3, 0.0  ;;  %v26_v8 = vsel %vm22_vm0, %v136_v4, 0.0  ;;  %v32_v9 = vsel %vm22_vm0, %v140_v5, 0.0 }
   0x5   :  { %24 = vadd.xlane.f32.xlu0 %v23_v6  ;;  %30 = vadd.xlane.f32.xlu1 %v29_v7 }
   0x9   :  { %27 = vadd.xlane.f32.xlu0 %v26_v8  ;;  %33 = vadd.xlane.f32.xlu1 %v32_v9 }
  0x92   :  { %v25_v10 = vpop.xlane.xlu0 %24  ;;  %v31_v11 = vpop.xlane.xlu1 %30 }
  0x93   :  { %v36_v12 = vmul.f32 0.015625, %v25_v10  ;;  %v38_v13 = vmul.f32 0.015625, %v31_v11 }
  0x95   :  { %v40_v14 = vsub.f32 %v135_v2, %v36_v12  ;;  %v42_v15 = vsub.f32 %v139_v3, %v38_v13 }
  0x96   :  { %v28_v16 = vpop.xlane.xlu0 %27  ;;  %v34_v17 = vpop.xlane.xlu1 %33 }
  0x97   :  { %v37_v18 = vmul.f32 0.015625, %v28_v16  ;;  %v39_v19 = vmul.f32 0.015625, %v34_v17  ;;  %v44_v20 = vmul.f32 %v40_v14, %v40_v14  ;;  %v46_v21 = vmul.f32 %v42_v15, %v42_v15 }
  0x99   :  { %v41_v22 = vsub.f32 %v136_v4, %v37_v18  ;;  %v43_v23 = vsub.f32 %v140_v5, %v39_v19  ;;  %v48_v24 = vsel %vm22_vm0, %v44_v20, 0.0  ;;  %v54_v25 = vsel %vm22_vm0, %v46_v21, 0.0 }
  0x9a   :  { %49 = vadd.xlane.f32.xlu0 %v48_v24 }
  0x9b   :  { %v45_v26 = vmul.f32 %v41_v22, %v41_v22  ;;  %v47_v27 = vmul.f32 %v43_v23, %v43_v23 }
  0x9d   :  { %v51_v28 = vsel %vm22_vm0, %v45_v26, 0.0  ;;  %v57_v29 = vsel %vm22_vm0, %v47_v27, 0.0 }
  0x9e   :  { %55 = vadd.xlane.f32.xlu0 %v54_v25  ;;  %52 = vadd.xlane.f32.xlu1 %v51_v28 }
  0xa2   :  { %58 = vadd.xlane.f32.xlu1 %v57_v29 }
 0x127   :  { %v50_v30 = vpop.xlane.xlu0 %49 }
 0x128   :  { %v60_v31 = vmul.f32 0.015625, %v50_v30 }
 0x12a   :  { %v64_v32 = vadd.f32 1e-12, %v60_v31 }
 0x12b   :  { %v53_v33 = vpop.xlane.xlu1 %52  ;;  %v56_v34 = vpop.xlane.xlu0 %55 }
 0x12c   :  { %142 = vrsqrt.f32 %v64_v32  ;;  %v61_v35 = vmul.f32 0.015625, %v53_v33  ;;  %v62_v36 = vmul.f32 0.015625, %v56_v34 }
 0x12e   :  { %v65_v37 = vadd.f32 1e-12, %v61_v35  ;;  %v66_v38 = vadd.f32 1e-12, %v62_v36 }
 0x12f   :  { %v59_v39 = vpop.xlane.xlu1 %58 }
 0x130   :  { %144 = vrsqrt.f32 %v65_v37  ;;  %v63_v40 = vmul.f32 0.015625, %v59_v39 }
 0x131   :  { %146 = vrsqrt.f32 %v66_v38 }
 0x132   :  { %v67_v41 = vadd.f32 1e-12, %v63_v40 }
 0x134   :  { %148 = vrsqrt.f32 %v67_v41 }
 0x136   :  { %v143_v42 = vpop.eup %142 }
 0x137   :  { %v72_v44 = vmul.f32 %v143_v42, %v40_v14 }
 0x139   :  { %v83_v46 = vmul.f32 %v123_v43, %v72_v44 }
 0x13a   :  { %v145_v47 = vpop.eup %144 }
 0x13b   :  { %v147_v48 = vpop.eup %146  ;;  %v94_v49 = vadd.f32 %v124_v45, %v83_v46  ;;  %v73_v50 = vmul.f32 %v145_v47, %v41_v22 }
 0x13c   :  { %v74_v51 = vmul.f32 %v147_v48, %v42_v15 }
 0x13d   :  { %v129_v52 = vpack.c.bf16 %v94_v49, %v94_v49  ;;  %v84_v53 = vmul.f32 %v123_v43, %v73_v50 }
 0x13e   :  { %v149_v54 = vpop.eup %148  ;;  %v85_v55 = vmul.f32 %v123_v43, %v74_v51 }
 0x13f   :  { %115 = vst.msk [vmem:[%s209_s3] sm:$0xf] %vm114_vm1, %v129_v52  ;;  %v95_v56 = vadd.f32 %v124_v45, %v84_v53  ;;  %v75_v57 = vmul.f32 %v149_v54, %v43_v23 }
 0x140   :  { %v96_v58 = vadd.f32 %v124_v45, %v85_v55 }
 0x141   :  { %v130_v59 = vpack.c.bf16 %v95_v56, %v95_v56  ;;  %v86_v60 = vmul.f32 %v123_v43, %v75_v57 }
 0x142   :  { %v131_v61 = vpack.c.bf16 %v96_v58, %v96_v58 }
 0x143   :  { %116 = vst.msk [vmem:[%s209_s3 + $0x4] sm:$0xf] %vm114_vm1, %v130_v59  ;;  %v97_v62 = vadd.f32 %v124_v45, %v86_v60 }
 0x144   :  { %117 = vst.msk [vmem:[%s209_s3 + $0x8] sm:$0xf] %vm114_vm1, %v131_v61 }
 0x145   :  { %v132_v63 = vpack.c.bf16 %v97_v62, %v97_v62 }
 0x147   :  { %118 = vst.msk [vmem:[%s209_s3 + $0xc] sm:$0xf] %vm114_vm1, %v132_v63 }

// kernel: next_sentence_prediction_forward.13
= control target key start
LH: loop header
LB: loop body
LE: loop exit
PB: predicated region body
PF: predicated region fallthrough
CT: control target
= control target key end

     0   :  { %vm20_vm0 = vcmask 523264   ;;  %v284_v1 = vmov 0   ;;  %v285_v2 = vmov 0.0   ;;  %v187_v12 = vlaneseq  ;;  %s361_s1 = inlined_call_operand.vmem [shape: bf16[64,192], index: 1, kind: input, shape index: {}]   ;;  %s362_s0 = inlined_call_operand.vmem [shape: bf16[32,64], index: 0, kind: input, shape index: {}]   ;;  %s363_s2 = inlined_call_operand.vmem [shape: f32[1,192], index: 2, kind: input, shape index: {}]   ;;  %s364_s3 = inlined_call_operand.vmem [shape: bf16[32,192], index: 3, kind: output, shape index: {}]  }
   0x1   :  { %v270_v0 = vld [vmem:[%s361_s1 + $0x4] ss:$8 sps:$4 sm:$0xff]   ;;  %137 = vmatprep.mubr.bf16.mxu0 %v284_v1  ;;  %147 = vmatprep.mubr.bf16.mxu1 %v284_v1  ;;  %21 = vst.msk [vmem:[#allocation2 + $0x8] sm:$0xff] %vm20_vm0, %v285_v2  ;;  %23 = vst.msk [vmem:[#allocation2 + $0x18] sm:$0xff] %vm20_vm0, %v285_v2  ;;  %v272_v3 = vld [vmem:[%s361_s1] ss:$8 sps:$4 sm:$0xff]  }
   0x2   :  { %25 = vst.msk [vmem:[#allocation2 + $0x28] sm:$0xff] %vm20_vm0, %v285_v2  ;;  %27 = vst.msk [vmem:[#allocation2 + $0x38] sm:$0xff] %vm20_vm0, %v285_v2  ;;  %105 = vmatprep.subr.bf16.mxu0 %v270_v0  ;;  %260 = vmatprep.subr.bf16.mxu1 %v270_v0  ;;  %v273_v4 = vld [vmem:[%s361_s1 + $0x14] ss:$8 sps:$4 sm:$0xff]   ;;  %v275_v5 = vld [vmem:[%s361_s1 + $0x10] ss:$8 sps:$4 sm:$0xff]  }
   0x3   :  { %106 = vmatpush1.bf16.msra.mxu0 %v272_v3  ;;  %264 = vmatpush1.bf16.msra.mxu1 %v272_v3  ;;  %v276_v6 = vld [vmem:[%s361_s1 + $0x24] ss:$8 sps:$4 sm:$0xff]   ;;  %v278_v7 = vld [vmem:[%s361_s1 + $0x20] ss:$8 sps:$4 sm:$0xff]   ;;  %v279_v8 = vld [vmem:[%s361_s1 + $0x34] ss:$8 sps:$4 sm:$0xff]  }
   0x4   :  { %107 = vmatprep.subr.bf16.mxu0 %v273_v4  ;;  %261 = vmatprep.subr.bf16.mxu1 %v273_v4  ;;  %v281_v9 = vld [vmem:[%s361_s1 + $0x30] ss:$8 sps:$4 sm:$0xff]   ;;  %v282_v10 = vld [vmem:[%s362_s0] sm:$0xff]   ;;  %v283_v11 = vld [vmem:[%s362_s0 + $0x8] sm:$0xff]   ;;  %v188_v16 = vshrl.u32 %v187_v12, 7  ;;  %vm229_vm1 = vcmask 1043456  }
   0x5   :  { %v185_v32 = vld [vmem:[%s363_s2] sm:$0x3]  ;;  %vm230_vm2 = vcmask 523268  }
   0x6   :  { %v189_v28 = vsub.s32 0, %v188_v16  ;;  %v193_v29 = vsub.s32 1, %v188_v16  ;;  %vm231_vm3 = vmor %vm230_vm2, %vm229_vm1 }
   0x7   :  { %108 = vmatpush1.bf16.msra.mxu0 %v275_v5  ;;  %265 = vmatpush1.bf16.msra.mxu1 %v275_v5 }
   0x8   :  { %109 = vmatprep.subr.bf16.mxu0 %v276_v6  ;;  %262 = vmatprep.subr.bf16.mxu1 %v276_v6  ;;  %v29_v13 = vld [vmem:[#allocation2 + $0x8] sm:$0xff]  ;;  %v31_v20 = vld [vmem:[#allocation2 + $0x18] sm:$0xff]  ;;  %v190_v33 = vrot.slane %v185_v32, %v189_v28  ;;  %v194_v34 = vrot.slane %v185_v32, %v193_v29 }
   0x9   :  { %v33_v14 = vld [vmem:[#allocation2 + $0x28] sm:$0xff]  ;;  %v35_v21 = vld [vmem:[#allocation2 + $0x38] sm:$0xff] }
   0xb   :  { %110 = vmatpush1.bf16.msra.mxu0 %v278_v7  ;;  %266 = vmatpush1.bf16.msra.mxu1 %v278_v7 }
   0xc   :  { %111 = vmatprep.subr.bf16.mxu0 %v279_v8  ;;  %263 = vmatprep.subr.bf16.mxu1 %v279_v8 }
   0xf   :  { %112 = vmatpush1.bf16.msra.mxu0 %v281_v9  ;;  %267 = vmatpush1.bf16.msra.mxu1 %v281_v9 }
  0x12   :  { %250 = vmatmul.mubr.msk.bf16.vlgmr.msra.gmra.mrb[0].mxu0 %vm20_vm0, %v282_v10  ;;  %251 = vmatmul.mubr.msk.bf16.vlgmr.msra.gmra.mrb[0].mxu1 %vm20_vm0, %v283_v11 }
  0xe5   :  { %v139_v15 = vpop.f32.mrb[0].mxu0  ;;  %v149_v17 = vpop.f32.mrb[0].mxu1 }
  0xe6   :  { %v141_v18 = vpop.f32.mrb[1].mxu0  ;;  %v151_v19 = vpop.f32.mrb[1].mxu1  ;;  %v197_v37 = vadd.f32 %v190_v33, %v139_v15  ;;  %v201_v38 = vadd.f32 %v190_v33, %v149_v17 }
  0xe7   :  { %v159_v22 = vadd.f32 %v141_v18, %v29_v13  ;;  %v163_v23 = vadd.f32 %v151_v19, %v33_v14  ;;  %v143_v24 = vpop.f32.mrb[2].mxu0  ;;  %v153_v25 = vpop.f32.mrb[2].mxu1 }
  0xe8   :  { %v145_v26 = vpop.f32.mrb[3].mxu0  ;;  %v155_v27 = vpop.f32.mrb[3].mxu1  ;;  %v199_v41 = vadd.f32 %v190_v33, %v143_v24  ;;  %v203_v42 = vadd.f32 %v190_v33, %v153_v25 }
  0xe9   :  { %167 = vst.msk [vmem:[#allocation2 + $0x8] sm:$0xff] %vm20_vm0, %v159_v22  ;;  %171 = vst.msk [vmem:[#allocation2 + $0x28] sm:$0xff] %vm20_vm0, %v163_v23  ;;  %v161_v30 = vadd.f32 %v145_v26, %v31_v20  ;;  %v165_v31 = vadd.f32 %v155_v27, %v35_v21 }
  0xeb   :  { %169 = vst.msk [vmem:[#allocation2 + $0x18] sm:$0xff] %vm20_vm0, %v161_v30  ;;  %173 = vst.msk [vmem:[#allocation2 + $0x38] sm:$0xff] %vm20_vm0, %v165_v31 }
  0xf0   :  { %v178_v35 = vld [vmem:[#allocation2 + $0x8] sm:$0xff] }
  0xf1   :  { %v182_v36 = vld [vmem:[#allocation2 + $0x28] sm:$0xff]  ;;  %v198_v39 = vadd.f32 %v194_v34, %v178_v35 }
  0xf2   :  { %v202_v40 = vadd.f32 %v194_v34, %v182_v36  ;;  %v180_v43 = vld [vmem:[#allocation2 + $0x18] sm:$0xff] }
  0xf3   :  { %v184_v44 = vld [vmem:[#allocation2 + $0x38] sm:$0xff]  ;;  %v256_v45 = vpack.c.bf16 %v198_v39, %v197_v37  ;;  %v200_v47 = vadd.f32 %v194_v34, %v180_v43 }
  0xf4   :  { %v258_v46 = vpack.c.bf16 %v202_v40, %v201_v38  ;;  %v204_v48 = vadd.f32 %v194_v34, %v184_v44 }
  0xf5   :  { %232 = vst.msk [vmem:[%s364_s3] sm:$0xff] %vm231_vm3, %v256_v45  ;;  %v257_v49 = vpack.c.bf16 %v200_v47, %v199_v41 }
  0xf6   :  { %234 = vst.msk [vmem:[%s364_s3 + $0x10] sm:$0xff] %vm231_vm3, %v258_v46  ;;  %v259_v50 = vpack.c.bf16 %v204_v48, %v203_v42 }
  0xf7   :  { %233 = vst.msk [vmem:[%s364_s3 + $0x8] sm:$0xff] %vm231_vm3, %v257_v49 }
  0xf8   :  { %235 = vst.msk [vmem:[%s364_s3 + $0x18] sm:$0xff] %vm231_vm3, %v259_v50 }

// kernel: next_sentence_prediction_forward.15
= control target key start
LH: loop header
LB: loop body
LE: loop exit
PB: predicated region body
PF: predicated region fallthrough
CT: control target
= control target key end

     0   :  { %vm28_vm0 = vcmask 523264   ;;  %v338_v1 = vmov 0.0   ;;  %vm268_vm1 = vcmask 519168   ;;  %s441_s1 = inlined_call_operand.vmem [shape: bf16[64,64], index: 1, kind: input, shape index: {}]   ;;  %s442_s0 = inlined_call_operand.vmem [shape: bf16[32,64], index: 0, kind: input, shape index: {}]   ;;  %s443_s3 = inlined_call_operand.vmem [shape: bf16[32,64], index: 3, kind: input, shape index: {}]   ;;  %s444_s2 = inlined_call_operand.vmem [shape: f32[1,64], index: 2, kind: input, shape index: {}]   ;;  %s445_s4 = inlined_call_operand.vmem [shape: f32[1,64], index: 4, kind: input, shape index: {}]   ;;  %s446_s5 = inlined_call_operand.vmem [shape: f32[1,64], index: 5, kind: input, shape index: {}]   ;;  %s447_s6 = inlined_call_operand.vmem [shape: bf16[32,64], index: 6, kind: output, shape index: {}]  }
   0x1   :  { %v324_v0 = vld [vmem:[%s441_s1] sm:$0xff]   ;;  %31 = vst.msk [vmem:[#allocation2 + $0x10] sm:$0xff] %vm28_vm0, %v338_v1  ;;  %29 = vst.msk [vmem:[#allocation2] sm:$0xff] %vm28_vm0, %v338_v1  ;;  %v325_v2 = vld [vmem:[%s441_s1 + $0x8] sm:$0xff]  }
   0x2   :  { %30 = vst.msk [vmem:[#allocation2 + $0x8] sm:$0xff] %vm28_vm0, %v338_v1  ;;  %32 = vst.msk [vmem:[#allocation2 + $0x18] sm:$0xff] %vm28_vm0, %v338_v1  ;;  %311 = vmatprep.subr.bf16.mxu0 %v324_v0  ;;  %v326_v3 = vld [vmem:[%s441_s1 + $0x10] sm:$0xff]   ;;  %v328_v4 = vld [vmem:[%s442_s0] sm:$0xff]  }
   0x3   :  { %312 = vmatpush3.bf16.msra.mxu0 %v324_v0  ;;  %319 = vmatprep.mubr.msk.bf16.mxu0 %vm28_vm0, %v328_v4  ;;  %v327_v5 = vld [vmem:[%s441_s1 + $0x18] sm:$0xff]   ;;  %v329_v6 = vld [vmem:[%s442_s0 + $0x8] sm:$0xff]   ;;  %v297_v20 = vld [vmem:[%s443_s3] sm:$0xff]  }
   0x4   :  { %313 = vmatprep.subr.bf16.mxu0 %v325_v2  ;;  %v304_v19 = vld [vmem:[%s443_s3 + $0x8] sm:$0xff]   ;;  %v285_v21 = vld [vmem:[%s444_s2] ss:$0 sm:$0xff]  ;;  %v298_v24 = vunpack.c.l.bf16 %v297_v20  ;;  %v299_v30 = vunpack.c.h.bf16 %v297_v20 }
   0x5   :  { %v302_v22 = vunpack.c.l.bf16 %v304_v19  ;;  %v303_v27 = vunpack.c.h.bf16 %v304_v19 }
   0x7   :  { %314 = vmatpush3.bf16.msra.mxu0 %v325_v2 }
   0x8   :  { %315 = vmatprep.subr.bf16.mxu0 %v326_v3  ;;  %v35_v7 = vld [vmem:[#allocation2 + $0x10] sm:$0xff]  ;;  %v33_v8 = vld [vmem:[#allocation2] sm:$0xff] }
   0x9   :  { %v36_v10 = vld [vmem:[#allocation2 + $0x18] sm:$0xff]  ;;  %v34_v13 = vld [vmem:[#allocation2 + $0x8] sm:$0xff] }
   0xb   :  { %316 = vmatpush3.bf16.msra.mxu0 %v326_v3 }
   0xc   :  { %317 = vmatprep.subr.bf16.mxu0 %v327_v5 }
   0xf   :  { %318 = vmatpush3.bf16.msra.mxu0 %v327_v5 }
  0x12   :  { %320 = vmatmul.mubr.msk.bf16.vlgmr.msra.gmra.mrb[0].mxu0 %vm28_vm0, %v329_v6 }
  0xe5   :  { %v321_v9 = vpop.f32.mrb[0].mxu0 }
  0xe6   :  { %v141_v11 = vadd.f32 %v321_v9, %v35_v7  ;;  %v124_v12 = vpop.f32.mrb[1].mxu0 }
  0xe7   :  { %v139_v14 = vadd.f32 %v124_v12, %v33_v8  ;;  %v322_v15 = vpop.f32.mrb[2].mxu0 }
  0xe8   :  { %145 = vst.msk [vmem:[#allocation2 + $0x10] sm:$0xff] %vm28_vm0, %v141_v11  ;;  %v142_v16 = vadd.f32 %v322_v15, %v36_v10  ;;  %v127_v17 = vpop.f32.mrb[3].mxu0  ;;  %v286_v11 = vld [vmem:[%s445_s4] ss:$0 sm:$0xff] }
  0xe9   :  { %143 = vst.msk [vmem:[#allocation2] sm:$0xff] %vm28_vm0, %v139_v14  ;;  %v140_v18 = vadd.f32 %v127_v17, %v34_v13  ;;  %v287_v13 = vld [vmem:[%s446_s5] ss:$0 sm:$0xff] }
  0xea   :  { %146 = vst.msk [vmem:[#allocation2 + $0x18] sm:$0xff] %vm28_vm0, %v142_v16 }
  0xeb   :  { %144 = vst.msk [vmem:[#allocation2 + $0x8] sm:$0xff] %vm28_vm0, %v140_v18 }
  0xef   :  { %v152_v23 = vld [vmem:[#allocation2 + $0x10] sm:$0xff] }
  0xf0   :  { %v163_v25 = vadd.f32 %v285_v21, %v152_v23  ;;  %v150_v26 = vld [vmem:[#allocation2] sm:$0xff] }
  0xf1   :  { %v161_v28 = vadd.f32 %v285_v21, %v150_v26  ;;  %v153_v29 = vld [vmem:[#allocation2 + $0x18] sm:$0xff] }
  0xf2   :  { %v175_v31 = vadd.f32 %v302_v22, %v163_v25  ;;  %v164_v32 = vadd.f32 %v285_v21, %v153_v29  ;;  %v151_v33 = vld [vmem:[#allocation2 + $0x8] sm:$0xff] }
  0xf3   :  { %v173_v34 = vadd.f32 %v298_v24, %v161_v28  ;;  %v162_v35 = vadd.f32 %v285_v21, %v151_v33 }
  0xf4   :  { %v183_v36 = vsel %vm28_vm0, %v175_v31, 0.0  ;;  %v176_v37 = vadd.f32 %v303_v27, %v164_v32 }
  0xf5   :  { %184 = vadd.xlane.f32.xlu1 %v183_v36  ;;  %v177_v38 = vsel %vm28_vm0, %v173_v34, 0.0  ;;  %v174_v39 = vadd.f32 %v299_v30, %v162_v35 }
  0xf6   :  { %178 = vadd.xlane.f32.xlu0 %v177_v38  ;;  %v186_v40 = vsel %vm28_vm0, %v176_v37, 0.0 }
  0xf7   :  { %v180_v41 = vsel %vm28_vm0, %v174_v39, 0.0 }
  0xf9   :  { %187 = vadd.xlane.f32.xlu1 %v186_v40 }
  0xfa   :  { %181 = vadd.xlane.f32.xlu0 %v180_v41 }
 0x182   :  { %v185_v42 = vpop.xlane.xlu1 %184 }
 0x183   :  { %v192_v43 = vmul.f32 0.015625, %v185_v42  ;;  %v179_v44 = vpop.xlane.xlu0 %178 }
 0x184   :  { %v190_v45 = vmul.f32 0.015625, %v179_v44 }
 0x185   :  { %v196_v46 = vsub.f32 %v175_v31, %v192_v43 }
 0x186   :  { %v194_v47 = vsub.f32 %v173_v34, %v190_v45  ;;  %v188_v48 = vpop.xlane.xlu1 %187 }
 0x187   :  { %v193_v49 = vmul.f32 0.015625, %v188_v48  ;;  %v182_v50 = vpop.xlane.xlu0 %181  ;;  %v200_v56 = vmul.f32 %v196_v46, %v196_v46 }
 0x188   :  { %v191_v51 = vmul.f32 0.015625, %v182_v50  ;;  %v198_v52 = vmul.f32 %v194_v47, %v194_v47 }
 0x189   :  { %v197_v53 = vsub.f32 %v176_v37, %v193_v49  ;;  %v208_v58 = vsel %vm28_vm0, %v200_v56, 0.0 }
 0x18a   :  { %v195_v54 = vsub.f32 %v174_v39, %v191_v51  ;;  %v202_v55 = vsel %vm28_vm0, %v198_v52, 0.0 }
 0x18b   :  { %203 = vadd.xlane.f32.xlu0 %v202_v55  ;;  %v201_v60 = vmul.f32 %v197_v53, %v197_v53 }
 0x18c   :  { %v199_v57 = vmul.f32 %v195_v54, %v195_v54 }
 0x18d   :  { %v211_v61 = vsel %vm28_vm0, %v201_v60, 0.0 }
 0x18e   :  { %v205_v59 = vsel %vm28_vm0, %v199_v57, 0.0 }
 0x18f   :  { %209 = vadd.xlane.f32.xlu0 %v208_v58  ;;  %206 = vadd.xlane.f32.xlu1 %v205_v59 }
 0x193   :  { %212 = vadd.xlane.f32.xlu1 %v211_v61 }
 0x218   :  { %v204_v62 = vpop.xlane.xlu0 %203 }
 0x219   :  { %v214_v63 = vmul.f32 0.015625, %v204_v62 }
 0x21b   :  { %v218_v0 = vadd.f32 1e-12, %v214_v63 }
 0x21c   :  { %v207_v1 = vpop.xlane.xlu1 %206  ;;  %v210_v2 = vpop.xlane.xlu0 %209 }
 0x21d   :  { %330 = vrsqrt.f32 %v218_v0  ;;  %v215_v3 = vmul.f32 0.015625, %v207_v1  ;;  %v216_v4 = vmul.f32 0.015625, %v210_v2 }
 0x21f   :  { %v219_v5 = vadd.f32 1e-12, %v215_v3  ;;  %v220_v6 = vadd.f32 1e-12, %v216_v4 }
 0x220   :  { %v213_v7 = vpop.xlane.xlu1 %212 }
 0x221   :  { %332 = vrsqrt.f32 %v219_v5  ;;  %v217_v8 = vmul.f32 0.015625, %v213_v7 }
 0x222   :  { %334 = vrsqrt.f32 %v220_v6 }
 0x223   :  { %v221_v9 = vadd.f32 1e-12, %v217_v8 }
 0x225   :  { %336 = vrsqrt.f32 %v221_v9 }
 0x227   :  { %v331_v10 = vpop.eup %330 }
 0x228   :  { %v226_v12 = vmul.f32 %v331_v10, %v194_v47 }
 0x22a   :  { %v237_v14 = vmul.f32 %v286_v11, %v226_v12 }
 0x22b   :  { %v333_v15 = vpop.eup %332 }
 0x22c   :  { %v335_v16 = vpop.eup %334  ;;  %v248_v17 = vadd.f32 %v287_v13, %v237_v14  ;;  %v227_v18 = vmul.f32 %v333_v15, %v195_v54 }
 0x22d   :  { %v228_v19 = vmul.f32 %v335_v16, %v196_v46 }
 0x22e   :  { %v292_v20 = vpack.c.bf16 %v248_v17, %v248_v17  ;;  %v238_v21 = vmul.f32 %v286_v11, %v227_v18 }
 0x22f   :  { %v337_v22 = vpop.eup %336  ;;  %v239_v23 = vmul.f32 %v286_v11, %v228_v19 }
 0x230   :  { %269 = vst.msk [vmem:[%s447_s6] sm:$0xf] %vm268_vm1, %v292_v20  ;;  %v249_v24 = vadd.f32 %v287_v13, %v238_v21  ;;  %v229_v25 = vmul.f32 %v337_v22, %v197_v53 }
 0x231   :  { %v250_v26 = vadd.f32 %v287_v13, %v239_v23 }
 0x232   :  { %v293_v27 = vpack.c.bf16 %v249_v24, %v249_v24  ;;  %v240_v28 = vmul.f32 %v286_v11, %v229_v25 }
 0x233   :  { %v294_v29 = vpack.c.bf16 %v250_v26, %v250_v26 }
 0x234   :  { %270 = vst.msk [vmem:[%s447_s6 + $0x4] sm:$0xf] %vm268_vm1, %v293_v27  ;;  %v251_v30 = vadd.f32 %v287_v13, %v240_v28 }
 0x235   :  { %271 = vst.msk [vmem:[%s447_s6 + $0x8] sm:$0xf] %vm268_vm1, %v294_v29 }
 0x236   :  { %v295_v31 = vpack.c.bf16 %v251_v30, %v251_v30 }
 0x238   :  { %272 = vst.msk [vmem:[%s447_s6 + $0xc] sm:$0xf] %vm268_vm1, %v295_v31 }

// kernel: next_sentence_prediction_forward.14
= control target key start
LH: loop header
LB: loop body
LE: loop exit
PB: predicated region body
PF: predicated region fallthrough
CT: control target
= control target key end

     0   :  { %s1144_s9 = smov 0   ;;  %s1146_s10 = smov 0   ;;  %s1278_s0 = inlined_call_operand.vmem [shape: f32[2,1,16], index: 0, kind: input, shape index: {}]   ;;  %s1279_s1 = inlined_call_operand.vmem [shape: bf16[2,16,192], index: 1, kind: input, shape index: {}]   ;;  %s1280_s2 = inlined_call_operand.vmem [shape: bf16[2,16,64], index: 2, kind: output, shape index: {}]  }
   0x1   :  { %s1148_s11 = smov 0  }
   0x2 LB: > { %s24_s12 = sadd.s32 1, %s1114_s10  ;;  %p922_p0 = scmp.ge.s32.totalorder %s1118_s11, 1  ;;  %s1118_s11 = sphi %s1148_s11, %s12_s11   ;;  %s1114_s10 = sphi %s1146_s10, %s1282_s10   ;;  %s1110_s9 = sphi %s1144_s9, %s1281_s9  }
   0x3   : > { %p26_p1 = scmp.ge.s32.totalorder %s24_s12, 2  ;;  %p134_p2 = scmp.lt.s32.totalorder %s1118_s11, 3 }
   0x5   : > { %s1284_s12 = smov (%p26_p1, %s24_s12), 0  ;;  %p135_p3 = pnand %p922_p0, %p134_p2 }
   0x6   : > { %p163_p4 = scmp.lt.s32.totalorder (!%p135_p3), %s1110_s9, 1  ;;  %v1120_v0 = vmov (!%p135_p3), 0.0   ;;  %vm1121_vm0 = vmmov (!%p135_p3), 0   ;;  %s1122_s17 = smov (!%p135_p3), 64   ;;  %vm209_vm1 = vcmask (!%p135_p3), 130048   ;;  %v260_v5 = vlaneseq (!%p135_p3) }
   0x7   : > { %138 = sbr.rel (%p135_p3) target bundleno = 1622 (0x656), region = 28  ;;  %971 = vmatprep.subr.bf16.mxu0 (!%p135_p3), %v1120_v0  ;;  %973 = vmatprep.mubr.msk.bf16.mxu0 (!%p135_p3), %vm1121_vm0, %v1120_v0  ;;  %s1123_s21 = smov (!%p135_p3), 48   ;;  %vm496_vm2 = vcmask (!%p135_p3), 261248   ;;  %vm653_vm3 = vcmask (!%p135_p3), 392448   ;;  %vm810_vm4 = vcmask (!%p135_p3), 523648   ;;  %vm823_vm5 = vcmask (!%p135_p3), 519168  }
   0x8   : > { %977 = vmatprep.subr.bf16.mxu1 (!%p135_p3), %v1120_v0  ;;  %979 = vmatprep.mubr.msk.bf16.mxu1 (!%p135_p3), %vm1121_vm0, %v1120_v0  ;;  %v261_v8 = vshrl.u32 (!%p135_p3), %v260_v5, 7  ;;  %s1124_s22 = smov (!%p135_p3), 96   ;;  %s1125_s23 = smov (!%p135_p3), 112  }
   0x9   : > { %s1126_s24 = smov (!%p135_p3), 32   ;;  %s1127_s25 = smov (!%p135_p3), 16  }
   0xa   : > { %v262_v10 = vsub.s32 (!%p135_p3), 0, %v261_v8  ;;  %s1128_s26 = smov (!%p135_p3), 80  }
   0xe   : > { %s1286_s9 = smov (!%p163_p4, %s1110_s9), 1 }
   0xf   : > { %s951_s13 = sshll.u32 %s1286_s9, 4  ;;  %s165_s20 = scalar_lea.vmem %s1278_s0, %s1286_s9 }
  0x10   : > { %s1174_s16 = scalar_lea.vmem %s1279_s1, %s951_s13  ;;  %v183_v6 = vld [vmem:[%s165_s20] sm:$0x1]  ;;  %s952_s27 = sshll.u32 %s1286_s9, 3 }
  0x11   : > { %v1052_v1 = vld [vmem:[%s1174_s16] ss:$8 sps:$4 sm:$0xff]   ;;  %v184_v7 = vsub.f32 1.0, %v183_v6  ;;  %v1060_v35 = vld [vmem:[%s1174_s16 + $0x4] ss:$8 sps:$4 sm:$0xff]   ;;  %s179_s30 = scalar_lea.vmem %s1280_s2, %s952_s27 }
  0x12   : > { %207 = vrot.lane.b32.xlu0 %v1052_v1, %s1122_s17  ;;  %v1053_v4 = vld [vmem:[%s1174_s16] ss:$8 sps:$4 sm:$0xff]   ;;  %978 = vmatpush3.bf16.msra.mxu1 %v1060_v35 }
  0x13   : > { %v185_v9 = vmul.f32 -10000.0, %v184_v7  ;;  %v1054_v22 = vld [vmem:[%s1174_s16] ss:$8 sps:$4 sm:$0xff]   ;;  %983 = vmatprep.subr.bf16.mxu1 %v1120_v0 }
  0x14   : > { %v1057_v23 = vld [vmem:[%s1174_s16] ss:$8 sps:$4 sm:$0xff]  }
  0x15   : > { %v1187_v11 = vrot.slane %v185_v9, %v262_v10  ;;  %v1055_v34 = vld [vmem:[%s1174_s16] ss:$8 sps:$4 sm:$0xff]  }
  0x16   : > { %v1056_v36 = vld [vmem:[%s1174_s16] ss:$8 sps:$4 sm:$0xff]  }
  0x17   : > { %v1058_v37 = vld [vmem:[%s1174_s16] ss:$8 sps:$4 sm:$0xff]  }
  0x18   : > { %v1059_v38 = vld [vmem:[%s1174_s16] ss:$8 sps:$4 sm:$0xff]  }
  0x84   : > { %v208_v2 = vpop.permute.xlu0 %207 }
  0x85   : > { %v214_v3 = vsel %vm209_vm1, %v208_v2, 0 }
  0x86   : > { %972 = vmatpush3.bf16.xpose.msra.mxu0 %v214_v3 }
  0x87   : > { %989 = vmatprep.subr.bf16.mxu0 %v1120_v0 }
  0x8d   : > { %974 = vmatmul.mubr.msk.bf16.vlgmr.msra.gmra.mrb[0].mxu0 %vm209_vm1, %v1053_v4 }
  0x8e   : > { %991 = vmatprep.mubr.msk.bf16.mxu0 %vm1121_vm0, %v1120_v0 }
 0x160   : > { %v250_v12 = vpop.f32.mrb[0].mxu0 }
 0x161   : > { %v257_v13 = vmul.f32 0.25, %v250_v12  ;;  %v975_v14 = vpop.f32.mrb[1].mxu0 }
 0x162   : > { %v253_v15 = vpop.f32.mrb[2].mxu0 }
 0x163   : > { %v258_v16 = vmul.f32 0.25, %v253_v15  ;;  %v976_v17 = vpop.f32.mrb[3].mxu0  ;;  %v265_v18 = vadd.f32 %v1187_v11, %v257_v13 }
 0x165   : > { %v267_v19 = vsel %vm209_vm1, %v265_v18, -inf  ;;  %v266_v20 = vadd.f32 %v1187_v11, %v258_v16 }
 0x166   : > { %268 = vmax.xlane.f32.xlu0 %v267_v19 }
 0x167   : > { %v270_v21 = vsel %vm209_vm1, %v266_v20, -inf }
 0x168   : > { %271 = vmax.xlane.f32.xlu1 %v270_v21 }
 0x179   : > { %360 = vrot.lane.b32.xlu1 %v1054_v22, %s1123_s21 }
 0x17c   : > { %510 = vrot.lane.b32.xlu0 %v1057_v23, %s1124_s22 }
 0x1f3   : > { %v269_v24 = vpop.xlane.xlu0 %268 }
 0x1f4   : > { %v273_v25 = vsub.f32 %v265_v18, %v269_v24 }
 0x1f5   : > { %v272_v26 = vpop.xlane.xlu1 %271 }
 0x1f6   : > { %v275_v27 = vmul.f32 1.442695, %v273_v25  ;;  %v274_v28 = vsub.f32 %v266_v20, %v272_v26 }
 0x1f7   : > { %v511_v52 = vpop.permute.xlu0 %510 }
 0x1f8   : > { %1064 = vpow2.f32 %v275_v27  ;;  %v277_v29 = vmul.f32 1.442695, %v274_v28 }
 0x1f9   : > { %v361_v39 = vpop.permute.xlu1 %360 }
 0x1fa   : > { %1066 = vpow2.f32 %v277_v29  ;;  %v366_v48 = vsel %vm209_vm1, %v361_v39, 0 }
 0x202   : > { %v1065_v30 = vpop.eup %1064 }
 0x203   : > { %v279_v31 = vsel %vm209_vm1, %v1065_v30, 0.0 }
 0x204   : > { %v1067_v32 = vpop.eup %1066  ;;  %280 = vadd.xlane.f32.xlu1 %v279_v31 }
 0x205   : > { %v282_v33 = vsel %vm209_vm1, %v1067_v32, 0.0 }
 0x208   : > { %283 = vadd.xlane.f32.xlu1 %v282_v33 }
 0x219   : > { %353 = vrot.lane.b32.xlu1 %v1055_v34, %s1125_s23 }
 0x21d   : > { %517 = vrot.lane.b32.xlu1 %v1056_v36, %s1126_s24 }
 0x221   : > { %674 = vrot.lane.b32.xlu1 %v1058_v37, %s1127_s25 }
 0x225   : > { %667 = vrot.lane.b32.xlu1 %v1059_v38, %s1128_s26 }
 0x291   : > { %v281_v40 = vpop.xlane.xlu1 %280 }
 0x292   : > { %1068 = vrcp.f32 %v281_v40 }
 0x295   : > { %v284_v41 = vpop.xlane.xlu1 %283 }
 0x296   : > { %1070 = vrcp.f32 %v284_v41 }
 0x299   : > { %v354_v46 = vpop.permute.xlu1 %353 }
 0x29c   : > { %v1069_v42 = vpop.eup %1068 }
 0x29d   : > { %v287_v44 = vmul.f32 %v1069_v42, %v1065_v30  ;;  %v518_v49 = vpop.permute.xlu1 %517 }
 0x29e   : > { %v523_v50 = vsel %vm209_vm1, %v518_v49, 0 }
 0x2a0   : > { %v1071_v43 = vpop.eup %1070 }
 0x2a1   : > { %v288_v45 = vmul.f32 %v1071_v43, %v1067_v32  ;;  %v675_v51 = vpop.permute.xlu1 %674 }
 0x2a2   : > { %v680_v53 = vsel %vm209_vm1, %v675_v51, 0  ;;  %v1061_v51 = vld [vmem:[%s1174_s16 + $0x4] ss:$8 sps:$4 sm:$0xff]  }
 0x2a3   : > { %v289_v47 = vpack.c.bf16 %v288_v45, %v287_v44 }
 0x2a5   : > { %980 = vmatmul.mubr.msk.bf16.vlgmr.msra.gmra.mrb[0].mxu1 %vm209_vm1, %v289_v47  ;;  %v668_v54 = vpop.permute.xlu1 %667 }
 0x2a6   : > { %984 = vmatpush3.bf16.xpose.msra.mxu1 %v366_v48  ;;  %985 = vmatprep.mubr.msk.bf16.mxu1 %vm1121_vm0, %v1120_v0 }
 0x2a7   : > { %995 = vmatprep.subr.bf16.mxu1 %v1120_v0 }
 0x2ad   : > { %986 = vmatmul.mubr.msk.bf16.vlgmr.msra.gmra.mrb[4].mxu1 %vm209_vm1, %v354_v46 }
 0x2ae   : > { %996 = vmatpush3.bf16.xpose.msra.mxu1 %v523_v50  ;;  %997 = vmatprep.mubr.msk.bf16.mxu1 %vm1121_vm0, %v1120_v0 }
 0x2af   : > { %1007 = vmatprep.subr.bf16.mxu1 %v1120_v0 }
 0x2b5   : > { %998 = vmatmul.mubr.msk.bf16.vlgmr.msra.gmra.mrb[8].mxu1 %vm209_vm1, %v511_v52  ;;  %v1062_v52 = vld [vmem:[%s1174_s16 + $0x4] ss:$8 sps:$4 sm:$0xff]  }
 0x2b6   : > { %1008 = vmatpush3.bf16.xpose.msra.mxu1 %v680_v53  ;;  %1009 = vmatprep.mubr.msk.bf16.mxu1 %vm1121_vm0, %v1120_v0 }
 0x2bd   : > { %1010 = vmatmul.mubr.msk.bf16.vlgmr.msra.gmra.mrb[12].mxu1 %vm209_vm1, %v668_v54 }
 0x378   : > { %v333_v55 = vpop.f32.mrb[0].mxu1 }
 0x379   : > { %340 = vst.msk [vmem:[#allocation2] sm:$0xff] %vm209_vm1, %v333_v55  ;;  %v981_v56 = vpop.f32.mrb[1].mxu1 }
 0x37a   : > { %v336_v57 = vpop.f32.mrb[2].mxu1 }
 0x37b   : > { %341 = vst.msk [vmem:[#allocation2 + $0x8] sm:$0xff] %vm209_vm1, %v336_v57  ;;  %v982_v58 = vpop.f32.mrb[3].mxu1 }
 0x37c   : > { %v1063_v58 = vld [vmem:[%s1174_s16 + $0x4] ss:$8 sps:$4 sm:$0xff]  }
 0x380   : > { %v402_v59 = vpop.f32.mrb[4].mxu1 }
 0x381   : > { %v409_v60 = vmul.f32 0.25, %v402_v59  ;;  %v987_v61 = vpop.f32.mrb[5].mxu1 }
 0x382   : > { %v405_v62 = vpop.f32.mrb[6].mxu1 }
 0x383   : > { %v410_v63 = vmul.f32 0.25, %v405_v62  ;;  %v988_v1 = vpop.f32.mrb[7].mxu1  ;;  %v411_v2 = vadd.f32 %v409_v60, %v1187_v11 }
 0x385   : > { %v413_v3 = vsel %vm209_vm1, %v411_v2, -inf  ;;  %v412_v4 = vadd.f32 %v410_v63, %v1187_v11 }
 0x386   : > { %414 = vmax.xlane.f32.xlu1 %v413_v3 }
 0x387   : > { %v416_v5 = vsel %vm209_vm1, %v412_v4, -inf }
 0x388   : > { %417 = vmax.xlane.f32.xlu0 %v416_v5  ;;  %v559_v6 = vpop.f32.mrb[8].mxu1 }
 0x389   : > { %v566_v7 = vmul.f32 0.25, %v559_v6  ;;  %v999_v8 = vpop.f32.mrb[9].mxu1 }
 0x38a   : > { %v562_v9 = vpop.f32.mrb[10].mxu1 }
 0x38b   : > { %v567_v10 = vmul.f32 0.25, %v562_v9  ;;  %v1000_v12 = vpop.f32.mrb[11].mxu1  ;;  %v568_v13 = vadd.f32 %v566_v7, %v1187_v11 }
 0x38d   : > { %v570_v14 = vsel %vm209_vm1, %v568_v13, -inf  ;;  %v569_v15 = vadd.f32 %v567_v10, %v1187_v11 }
 0x38e   : > { %571 = vmax.xlane.f32.xlu1 %v570_v14 }
 0x38f   : > { %v573_v19 = vsel %vm209_vm1, %v569_v15, -inf }
 0x390   : > { %v716_v16 = vpop.f32.mrb[12].mxu1 }
 0x391   : > { %v723_v17 = vmul.f32 0.25, %v716_v16  ;;  %v1011_v18 = vpop.f32.mrb[13].mxu1 }
 0x392   : > { %574 = vmax.xlane.f32.xlu1 %v573_v19  ;;  %v719_v20 = vpop.f32.mrb[14].mxu1 }
 0x393   : > { %v724_v21 = vmul.f32 0.25, %v719_v20  ;;  %v725_v22 = vadd.f32 %v723_v17, %v1187_v11  ;;  %v1012_v23 = vpop.f32.mrb[15].mxu1 }
 0x395   : > { %v727_v24 = vsel %vm209_vm1, %v725_v22, -inf  ;;  %v726_v25 = vadd.f32 %v724_v21, %v1187_v11 }
 0x396   : > { %728 = vmax.xlane.f32.xlu0 %v727_v24 }
 0x397   : > { %v730_v26 = vsel %vm209_vm1, %v726_v25, -inf }
 0x398   : > { %731 = vmax.xlane.f32.xlu1 %v730_v26 }
 0x413   : > { %v415_v27 = vpop.xlane.xlu1 %414 }
 0x414   : > { %v419_v28 = vsub.f32 %v411_v2, %v415_v27 }
 0x415   : > { %v418_v29 = vpop.xlane.xlu0 %417 }
 0x416   : > { %v421_v30 = vmul.f32 1.442695, %v419_v28  ;;  %v420_v31 = vsub.f32 %v412_v4, %v418_v29 }
 0x418   : > { %1072 = vpow2.f32 %v421_v30  ;;  %v423_v32 = vmul.f32 1.442695, %v420_v31 }
 0x41a   : > { %1074 = vpow2.f32 %v423_v32 }
 0x41b   : > { %v572_v33 = vpop.xlane.xlu1 %571 }
 0x41c   : > { %v576_v34 = vsub.f32 %v568_v13, %v572_v33 }
 0x41e   : > { %v578_v35 = vmul.f32 1.442695, %v576_v34 }
 0x41f   : > { %v575_v36 = vpop.xlane.xlu1 %574 }
 0x420   : > { %1076 = vpow2.f32 %v578_v35  ;;  %v577_v37 = vsub.f32 %v569_v15, %v575_v36 }
 0x422   : > { %v1073_v38 = vpop.eup %1072  ;;  %v580_v11 = vmul.f32 1.442695, %v577_v37 }
 0x423   : > { %v729_v39 = vpop.xlane.xlu0 %728  ;;  %v425_v40 = vsel %vm209_vm1, %v1073_v38, 0.0 }
 0x424   : > { %v1075_v41 = vpop.eup %1074  ;;  %1078 = vpow2.f32 %v580_v11  ;;  %v733_v42 = vsub.f32 %v725_v22, %v729_v39  ;;  %426 = vadd.xlane.f32.xlu0 %v425_v40 }
 0x425   : > { %v428_v43 = vsel %vm209_vm1, %v1075_v41, 0.0  ;;  %v732_v53 = vpop.xlane.xlu1 %731 }
 0x426   : > { %v735_v44 = vmul.f32 1.442695, %v733_v42  ;;  %429 = vadd.xlane.f32.xlu1 %v428_v43  ;;  %v734_v54 = vsub.f32 %v726_v25, %v732_v53 }
 0x428   : > { %1080 = vpow2.f32 %v735_v44  ;;  %v737_v55 = vmul.f32 1.442695, %v734_v54 }
 0x42a   : > { %v1077_v45 = vpop.eup %1076  ;;  %1082 = vpow2.f32 %v737_v55 }
 0x42b   : > { %v582_v46 = vsel %vm209_vm1, %v1077_v45, 0.0 }
 0x42c   : > { %583 = vadd.xlane.f32.xlu0 %v582_v46 }
 0x42e   : > { %v1079_v47 = vpop.eup %1078 }
 0x42f   : > { %v585_v48 = vsel %vm209_vm1, %v1079_v47, 0.0 }
 0x430   : > { %586 = vadd.xlane.f32.xlu1 %v585_v48 }
 0x432   : > { %v1081_v49 = vpop.eup %1080 }
 0x433   : > { %v739_v50 = vsel %vm209_vm1, %v1081_v49, 0.0 }
 0x434   : > { %740 = vadd.xlane.f32.xlu0 %v739_v50  ;;  %v1083_v56 = vpop.eup %1082 }
 0x435   : > { %v742_v57 = vsel %vm209_vm1, %v1083_v56, 0.0 }
 0x441   : > { %598 = vrot.lane.b32.xlu1 %v1061_v51, %s1124_s22 }
 0x44a   : > { %441 = vrot.lane.b32.xlu0 %v1062_v52, %s1125_s23 }
 0x465   : > { %743 = vadd.xlane.f32.xlu1 %v742_v57 }
 0x476   : > { %755 = vrot.lane.b32.xlu1 %v1063_v58, %s1128_s26 }
 0x4b1   : > { %v427_v60 = vpop.xlane.xlu0 %426 }
 0x4b3   : > { %v430_v59 = vpop.xlane.xlu1 %429 }
 0x4b4   : > { %1084 = vrcp.f32 %v430_v59 }
 0x4b5   : > { %1086 = vrcp.f32 %v427_v60 }
 0x4b9   : > { %v584_v61 = vpop.xlane.xlu0 %583 }
 0x4bd   : > { %v587_v62 = vpop.xlane.xlu1 %586 }
 0x4be   : > { %1088 = vrcp.f32 %v587_v62  ;;  %v1085_v63 = vpop.eup %1084 }
 0x4bf   : > { %1090 = vrcp.f32 %v584_v61  ;;  %v1087_v2 = vpop.eup %1086  ;;  %v434_v3 = vmul.f32 %v1085_v63, %v1075_v41 }
 0x4c0   : > { %v433_v4 = vmul.f32 %v1087_v2, %v1073_v38 }
 0x4c1   : > { %v741_v1 = vpop.xlane.xlu0 %740  ;;  %v599_v8 = vpop.permute.xlu1 %598 }
 0x4c2   : > { %v435_v6 = vpack.c.bf16 %v434_v3, %v433_v4  ;;  %1092 = vrcp.f32 %v741_v1 }
 0x4c5   : > { %v442_v5 = vpop.permute.xlu0 %441 }
 0x4c6   : > { %990 = vmatpush3.bf16.msra.mxu0 %v442_v5 }
 0x4c7   : > { %1001 = vmatprep.subr.bf16.mxu0 %v1120_v0 }
 0x4c8   : > { %v1089_v7 = vpop.eup %1088 }
 0x4c9   : > { %992 = vmatmul.mubr.msk.bf16.vlgmr.msra.gmra.mrb[4].mxu0 %vm209_vm1, %v435_v6  ;;  %v1091_v9 = vpop.eup %1090  ;;  %v591_v10 = vmul.f32 %v1089_v7, %v1079_v47 }
 0x4ca   : > { %1002 = vmatpush3.bf16.msra.mxu0 %v599_v8  ;;  %1003 = vmatprep.mubr.msk.bf16.mxu0 %vm1121_vm0, %v1120_v0  ;;  %v590_v12 = vmul.f32 %v1091_v9, %v1077_v45 }
 0x4cb   : > { %1013 = vmatprep.subr.bf16.mxu0 %v1120_v0 }
 0x4cc   : > { %v592_v13 = vpack.c.bf16 %v591_v10, %v590_v12  ;;  %v1093_v16 = vpop.eup %1092 }
 0x4cd   : > { %v747_v18 = vmul.f32 %v1093_v16, %v1081_v49 }
 0x4d1   : > { %1004 = vmatmul.mubr.msk.bf16.vlgmr.msra.gmra.mrb[8].mxu0 %vm209_vm1, %v592_v13 }
 0x4d2   : > { %1015 = vmatprep.mubr.msk.bf16.mxu0 %vm1121_vm0, %v1120_v0 }
 0x4f2   : > { %v744_v14 = vpop.xlane.xlu1 %743 }
 0x4f3   : > { %1094 = vrcp.f32 %v744_v14 }
 0x4f6   : > { %v756_v15 = vpop.permute.xlu1 %755 }
 0x4f7   : > { %1014 = vmatpush3.bf16.msra.mxu0 %v756_v15 }
 0x4fd   : > { %v1095_v17 = vpop.eup %1094 }
 0x4fe   : > { %v748_v19 = vmul.f32 %v1095_v17, %v1083_v56 }
 0x500   : > { %v749_v20 = vpack.c.bf16 %v748_v19, %v747_v18 }
 0x502   : > { %1016 = vmatmul.mubr.msk.bf16.vlgmr.msra.gmra.mrb[12].mxu0 %vm209_vm1, %v749_v20 }
 0x59c   : > { %v481_v21 = vpop.f32.mrb[4].mxu0 }
 0x59d   : > { %490 = vrot.lane.b32.xlu0 %v481_v21, %s1127_s25  ;;  %v993_v22 = vpop.f32.mrb[5].mxu0 }
 0x59e   : > { %v484_v23 = vpop.f32.mrb[6].mxu0 }
 0x59f   : > { %492 = vrot.lane.b32.xlu1 %v484_v23, %s1127_s25  ;;  %v994_v0 = vpop.f32.mrb[7].mxu0 }
 0x5a4   : > { %v638_v24 = vpop.f32.mrb[8].mxu0 }
 0x5a5   : > { %647 = vrot.lane.b32.xlu0 %v638_v24, %s1126_s24  ;;  %v1005_v25 = vpop.f32.mrb[9].mxu0 }
 0x5a6   : > { %v641_v26 = vpop.f32.mrb[10].mxu0 }
 0x5a7   : > { %649 = vrot.lane.b32.xlu1 %v641_v26, %s1126_s24  ;;  %v1006_v27 = vpop.f32.mrb[11].mxu0 }
 0x5d5   : > { %v795_v28 = vpop.f32.mrb[12].mxu0 }
 0x5d6   : > { %804 = vrot.lane.b32.xlu0 %v795_v28, %s1123_s21  ;;  %v1017_v29 = vpop.f32.mrb[13].mxu0 }
 0x5d7   : > { %v798_v30 = vpop.f32.mrb[14].mxu0 }
 0x5d8   : > { %806 = vrot.lane.b32.xlu1 %v798_v30, %s1123_s21  ;;  %v1018_v31 = vpop.f32.mrb[15].mxu0 }
 0x60f   : > { %v491_v32 = vpop.permute.xlu0 %490 }
 0x610   : > { %497 = vst.msk [vmem:[#allocation2] sm:$0xff] %vm496_vm2, %v491_v32 }
 0x611   : > { %v493_v33 = vpop.permute.xlu1 %492 }
 0x612   : > { %498 = vst.msk [vmem:[#allocation2 + $0x8] sm:$0xff] %vm496_vm2, %v493_v33 }
 0x617   : > { %v648_v34 = vpop.permute.xlu0 %647 }
 0x618   : > { %654 = vst.msk [vmem:[#allocation2] sm:$0xff] %vm653_vm3, %v648_v34 }
 0x619   : > { %v650_v35 = vpop.permute.xlu1 %649 }
 0x61a   : > { %655 = vst.msk [vmem:[#allocation2 + $0x8] sm:$0xff] %vm653_vm3, %v650_v35 }
 0x648   : > { %v805_v36 = vpop.permute.xlu0 %804 }
 0x649   : > { %811 = vst.msk [vmem:[#allocation2] sm:$0xff] %vm810_vm4, %v805_v36 }
 0x64a   : > { %v807_v37 = vpop.permute.xlu1 %806 }
 0x64b   : > { %812 = vst.msk [vmem:[#allocation2 + $0x8] sm:$0xff] %vm810_vm4, %v807_v37 }
 0x650   : > { %v813_v38 = vld [vmem:[#allocation2] sm:$0xff] }
 0x651   : > { %v953_v11 = vpack.c.bf16 %v813_v38, %v813_v38 }
 0x652   : > { %v814_v39 = vld [vmem:[#allocation2 + $0x8] sm:$0xff] }
 0x653   : > { %824 = vst.msk [vmem:[%s179_s30] sm:$0xf] %vm823_vm5, %v953_v11  ;;  %v954_v40 = vpack.c.bf16 %v814_v39, %v814_v39 }
 0x655   : > { %825 = vst.msk [vmem:[%s179_s30 + $0x4] sm:$0xf] %vm823_vm5, %v954_v40 }
 0x656 PF: > { %s12_s11 = sadd.s32 1, %s1118_s11   ;;  %s1281_s9 = smov %s1114_s10 }
 0x657   : > { %p9_p5 = scmp.ge.s32.totalorder %s12_s11, 4   ;;  %s1282_s10 = smov %s1284_s12 }
 0x659   :  { %11 = sbr.rel (!%p9_p5) target bundleno = 2 (0x2), region = 62 }

// kernel: next_sentence_prediction_forward.16
= control target key start
LH: loop header
LB: loop body
LE: loop exit
PB: predicated region body
PF: predicated region fallthrough
CT: control target
= control target key end

     0   :  { %vm73_vm0 = vcmask 523264   ;;  %s322_s1 = inlined_call_operand.vmem [shape: bf16[64,128], index: 1, kind: input, shape index: {}]   ;;  %s323_s0 = inlined_call_operand.vmem [shape: bf16[32,64], index: 0, kind: input, shape index: {}]   ;;  %s324_s2 = inlined_call_operand.vmem [shape: f32[1,128], index: 2, kind: input, shape index: {}]   ;;  %s325_s3 = inlined_call_operand.vmem [shape: bf16[32,128], index: 3, kind: output, shape index: {}]  }
   0x1   :  { %v261_v0 = vld [vmem:[%s322_s1] sm:$0xff]   ;;  %v262_v1 = vld [vmem:[%s322_s1 + $0x8] sm:$0xff]   ;;  %v263_v2 = vld [vmem:[%s322_s1 + $0x10] sm:$0xff]  }
   0x2   :  { %249 = vmatprep.subr.bf16.mxu0 %v261_v0  ;;  %v265_v3 = vld [vmem:[%s323_s0] sm:$0xff]   ;;  %v264_v4 = vld [vmem:[%s322_s1 + $0x18] sm:$0xff]   ;;  %v266_v5 = vld [vmem:[%s323_s0 + $0x8] sm:$0xff]  }
   0x3   :  { %250 = vmatpush3.bf16.msra.mxu0 %v261_v0  ;;  %257 = vmatprep.mubr.msk.bf16.mxu0 %vm73_vm0, %v265_v3  ;;  %v223_v6 = vld [vmem:[%s324_s2] ss:$0 sm:$0xff] }
   0x4   :  { %251 = vmatprep.subr.bf16.mxu0 %v262_v1 }
   0x7   :  { %252 = vmatpush3.bf16.msra.mxu0 %v262_v1 }
   0x8   :  { %253 = vmatprep.subr.bf16.mxu0 %v263_v2 }
   0xb   :  { %254 = vmatpush3.bf16.msra.mxu0 %v263_v2 }
   0xc   :  { %255 = vmatprep.subr.bf16.mxu0 %v264_v4 }
   0xf   :  { %256 = vmatpush3.bf16.msra.mxu0 %v264_v4 }
  0x12   :  { %258 = vmatmul.mubr.msk.bf16.vlgmr.msra.gmra.mrb[0].mxu0 %vm73_vm0, %v266_v5 }
  0xe5   :  { %v259_v7 = vpop.f32.mrb[0].mxu0 }
  0xe6   :  { %v153_v8 = vadd.f32 %v259_v7, %v223_v6  ;;  %v114_v9 = vpop.f32.mrb[1].mxu0 }
  0xe7   :  { %v151_v10 = vadd.f32 %v223_v6, %v114_v9  ;;  %v260_v11 = vpop.f32.mrb[2].mxu0 }
  0xe8   :  { %v161_v12 = vmul.f32 0.044715, %v153_v8  ;;  %v154_v13 = vadd.f32 %v260_v11, %v223_v6  ;;  %v117_v14 = vpop.f32.mrb[3].mxu0  ;;  %v157_v41 = vmul.f32 0.5, %v153_v8 }
  0xe9   :  { %v159_v15 = vmul.f32 0.044715, %v151_v10  ;;  %v152_v16 = vadd.f32 %v223_v6, %v117_v14  ;;  %v155_v44 = vmul.f32 0.5, %v151_v10 }
  0xea   :  { %v165_v17 = vmul.f32 %v161_v12, %v153_v8  ;;  %v162_v18 = vmul.f32 0.044715, %v154_v13  ;;  %v158_v42 = vmul.f32 0.5, %v154_v13 }
  0xeb   :  { %v163_v19 = vmul.f32 %v159_v15, %v151_v10  ;;  %v160_v20 = vmul.f32 0.044715, %v152_v16  ;;  %v156_v45 = vmul.f32 0.5, %v152_v16 }
  0xec   :  { %v169_v21 = vmul.f32 %v165_v17, %v153_v8  ;;  %v166_v22 = vmul.f32 %v162_v18, %v154_v13 }
  0xed   :  { %v167_v23 = vmul.f32 %v163_v19, %v151_v10  ;;  %v164_v24 = vmul.f32 %v160_v20, %v152_v16 }
  0xee   :  { %v173_v25 = vadd.f32 %v169_v21, %v153_v8  ;;  %v170_v26 = vmul.f32 %v166_v22, %v154_v13 }
  0xef   :  { %v171_v27 = vadd.f32 %v167_v23, %v151_v10  ;;  %v168_v28 = vmul.f32 %v164_v24, %v152_v16 }
  0xf0   :  { %v177_v29 = vmul.f32 0.7978846, %v173_v25  ;;  %v174_v30 = vadd.f32 %v170_v26, %v154_v13 }
  0xf1   :  { %v175_v31 = vmul.f32 0.7978846, %v171_v27  ;;  %v172_v32 = vadd.f32 %v168_v28, %v152_v16 }
  0xf2   :  { %267 = vtanh.f32 %v177_v29  ;;  %v178_v33 = vmul.f32 0.7978846, %v174_v30 }
  0xf3   :  { %269 = vtanh.f32 %v175_v31  ;;  %v176_v34 = vmul.f32 0.7978846, %v172_v32 }
  0xf4   :  { %271 = vtanh.f32 %v178_v33 }
  0xf5   :  { %273 = vtanh.f32 %v176_v34 }
  0xfc   :  { %v268_v35 = vpop.eup %267 }
  0xfd   :  { %v270_v36 = vpop.eup %269  ;;  %v185_v37 = vadd.f32 1.0, %v268_v35 }
  0xfe   :  { %v272_v38 = vpop.eup %271  ;;  %v183_v39 = vadd.f32 1.0, %v270_v36 }
  0xff   :  { %v274_v40 = vpop.eup %273  ;;  %v186_v43 = vadd.f32 1.0, %v272_v38  ;;  %v189_v47 = vmul.f32 %v185_v37, %v157_v41 }
 0x100   :  { %v184_v46 = vadd.f32 1.0, %v274_v40  ;;  %v187_v49 = vmul.f32 %v183_v39, %v155_v44 }
 0x101   :  { %v190_v48 = vmul.f32 %v186_v43, %v158_v42 }
 0x102   :  { %v188_v50 = vmul.f32 %v184_v46, %v156_v45 }
 0x103   :  { %v240_v51 = vpack.c.bf16 %v190_v48, %v189_v47 }
 0x104   :  { %v235_v52 = vpack.c.bf16 %v188_v50, %v187_v49 }
 0x105   :  { %242 = vst [vmem:[%s325_s3 + $0x8] sm:$0xff] %v240_v51  }
 0x106   :  { %236 = vst [vmem:[%s325_s3] sm:$0xff] %v235_v52  }

// kernel: next_sentence_prediction_forward.17
= control target key start
LH: loop header
LB: loop body
LE: loop exit
PB: predicated region body
PF: predicated region fallthrough
CT: control target
= control target key end

     0   :  { %vm28_vm0 = vcmask 523264   ;;  %v384_v1 = vmov 0.0   ;;  %vm296_vm1 = vcmask 519168   ;;  %s497_s1 = inlined_call_operand.vmem [shape: bf16[128,64], index: 1, kind: input, shape index: {}]   ;;  %s498_s0 = inlined_call_operand.vmem [shape: bf16[32,128], index: 0, kind: input, shape index: {}]   ;;  %s499_s3 = inlined_call_operand.vmem [shape: bf16[32,64], index: 3, kind: input, shape index: {}]   ;;  %s500_s2 = inlined_call_operand.vmem [shape: f32[1,64], index: 2, kind: input, shape index: {}]   ;;  %s501_s4 = inlined_call_operand.vmem [shape: f32[1,64], index: 4, kind: input, shape index: {}]   ;;  %s502_s5 = inlined_call_operand.vmem [shape: f32[1,64], index: 5, kind: input, shape index: {}]   ;;  %s503_s6 = inlined_call_operand.vmem [shape: bf16[32,64], index: 6, kind: output, shape index: {}]  }
   0x1   :  { %v366_v0 = vld [vmem:[%s497_s1] sm:$0xff]   ;;  %31 = vst.msk [vmem:[#allocation2 + $0x10] sm:$0xff] %vm28_vm0, %v384_v1  ;;  %29 = vst.msk [vmem:[#allocation2] sm:$0xff] %vm28_vm0, %v384_v1  ;;  %v367_v2 = vld [vmem:[%s497_s1 + $0x8] sm:$0xff]  }
   0x2   :  { %30 = vst.msk [vmem:[#allocation2 + $0x8] sm:$0xff] %vm28_vm0, %v384_v1  ;;  %32 = vst.msk [vmem:[#allocation2 + $0x18] sm:$0xff] %vm28_vm0, %v384_v1  ;;  %345 = vmatprep.subr.bf16.mxu0 %v366_v0  ;;  %v368_v3 = vld [vmem:[%s497_s1 + $0x10] sm:$0xff]   ;;  %v369_v4 = vld [vmem:[%s497_s1 + $0x18] sm:$0xff]  }
   0x3   :  { %346 = vmatpush3.bf16.msra.mxu0 %v366_v0  ;;  %v374_v5 = vld [vmem:[%s498_s0] sm:$0xff]   ;;  %v371_v7 = vld [vmem:[%s497_s1 + $0x28] sm:$0xff]   ;;  %v372_v8 = vld [vmem:[%s497_s1 + $0x30] sm:$0xff]  }
   0x4   :  { %347 = vmatprep.subr.bf16.mxu0 %v367_v2  ;;  %361 = vmatprep.mubr.bf16.mxu0 %v374_v5  ;;  %v370_v6 = vld [vmem:[%s497_s1 + $0x20] sm:$0xff]   ;;  %v373_v9 = vld [vmem:[%s497_s1 + $0x38] sm:$0xff]   ;;  %v375_v10 = vld [vmem:[%s498_s0 + $0x8] sm:$0xff]  }
   0x5   :  { %v334_v23 = vld [vmem:[%s499_s3 + $0x8] sm:$0xff]   ;;  %v327_v24 = vld [vmem:[%s499_s3] sm:$0xff]  }
   0x6   :  { %v315_v25 = vld [vmem:[%s500_s2] ss:$0 sm:$0xff]  ;;  %v332_v26 = vunpack.c.l.bf16 %v334_v23  ;;  %v328_v28 = vunpack.c.l.bf16 %v327_v24  ;;  %v333_v31 = vunpack.c.h.bf16 %v334_v23  ;;  %v329_v34 = vunpack.c.h.bf16 %v327_v24 }
   0x7   :  { %348 = vmatpush3.bf16.msra.mxu0 %v367_v2 }
   0x8   :  { %349 = vmatprep.subr.bf16.mxu0 %v368_v3  ;;  %v35_v11 = vld [vmem:[#allocation2 + $0x10] sm:$0xff]  ;;  %v33_v12 = vld [vmem:[#allocation2] sm:$0xff] }
   0x9   :  { %v36_v14 = vld [vmem:[#allocation2 + $0x18] sm:$0xff]  ;;  %v34_v17 = vld [vmem:[#allocation2 + $0x8] sm:$0xff] }
   0xb   :  { %350 = vmatpush3.bf16.msra.mxu0 %v368_v3 }
   0xc   :  { %351 = vmatprep.subr.bf16.mxu0 %v369_v4 }
   0xf   :  { %352 = vmatpush3.bf16.msra.mxu0 %v369_v4 }
  0x10   :  { %353 = vmatprep.subr.bf16.mxu0 %v370_v6 }
  0x13   :  { %354 = vmatpush3.bf16.msra.mxu0 %v370_v6 }
  0x14   :  { %355 = vmatprep.subr.bf16.mxu0 %v371_v7 }
  0x17   :  { %356 = vmatpush3.bf16.msra.mxu0 %v371_v7 }
  0x18   :  { %357 = vmatprep.subr.bf16.mxu0 %v372_v8 }
  0x1b   :  { %358 = vmatpush3.bf16.msra.mxu0 %v372_v8 }
  0x1c   :  { %359 = vmatprep.subr.bf16.mxu0 %v373_v9 }
  0x1f   :  { %360 = vmatpush3.bf16.msra.mxu0 %v373_v9 }
  0x22   :  { %362 = vmatmul.mubr.bf16.vlgmr.msra.gmra.mrb[0].mxu0 %v375_v10 }
  0xf5   :  { %v363_v13 = vpop.f32.mrb[0].mxu0 }
  0xf6   :  { %v168_v15 = vadd.f32 %v363_v13, %v35_v11  ;;  %v151_v16 = vpop.f32.mrb[1].mxu0 }
  0xf7   :  { %v166_v18 = vadd.f32 %v151_v16, %v33_v12  ;;  %v364_v19 = vpop.f32.mrb[2].mxu0 }
  0xf8   :  { %173 = vst.msk [vmem:[#allocation2 + $0x10] sm:$0xff] %vm28_vm0, %v168_v15  ;;  %v169_v20 = vadd.f32 %v364_v19, %v36_v14  ;;  %v154_v21 = vpop.f32.mrb[3].mxu0  ;;  %v316_v15 = vld [vmem:[%s501_s4] ss:$0 sm:$0xff] }
  0xf9   :  { %171 = vst.msk [vmem:[#allocation2] sm:$0xff] %vm28_vm0, %v166_v18  ;;  %v167_v22 = vadd.f32 %v154_v21, %v34_v17  ;;  %v317_v17 = vld [vmem:[%s502_s5] ss:$0 sm:$0xff] }
  0xfa   :  { %174 = vst.msk [vmem:[#allocation2 + $0x18] sm:$0xff] %vm28_vm0, %v169_v20 }
  0xfb   :  { %172 = vst.msk [vmem:[#allocation2 + $0x8] sm:$0xff] %vm28_vm0, %v167_v22 }
  0xff   :  { %v180_v27 = vld [vmem:[#allocation2 + $0x10] sm:$0xff] }
 0x100   :  { %v191_v29 = vadd.f32 %v315_v25, %v180_v27  ;;  %v178_v30 = vld [vmem:[#allocation2] sm:$0xff] }
 0x101   :  { %v189_v32 = vadd.f32 %v315_v25, %v178_v30  ;;  %v181_v33 = vld [vmem:[#allocation2 + $0x18] sm:$0xff] }
 0x102   :  { %v203_v35 = vadd.f32 %v332_v26, %v191_v29  ;;  %v192_v36 = vadd.f32 %v315_v25, %v181_v33  ;;  %v179_v37 = vld [vmem:[#allocation2 + $0x8] sm:$0xff] }
 0x103   :  { %v201_v38 = vadd.f32 %v328_v28, %v189_v32  ;;  %v190_v39 = vadd.f32 %v315_v25, %v179_v37 }
 0x104   :  { %v211_v40 = vsel %vm28_vm0, %v203_v35, 0.0  ;;  %v204_v41 = vadd.f32 %v333_v31, %v192_v36 }
 0x105   :  { %212 = vadd.xlane.f32.xlu1 %v211_v40  ;;  %v205_v42 = vsel %vm28_vm0, %v201_v38, 0.0  ;;  %v202_v43 = vadd.f32 %v329_v34, %v190_v39 }
 0x106   :  { %206 = vadd.xlane.f32.xlu0 %v205_v42  ;;  %v214_v44 = vsel %vm28_vm0, %v204_v41, 0.0 }
 0x107   :  { %v208_v45 = vsel %vm28_vm0, %v202_v43, 0.0 }
 0x109   :  { %215 = vadd.xlane.f32.xlu1 %v214_v44 }
 0x10a   :  { %209 = vadd.xlane.f32.xlu0 %v208_v45 }
 0x192   :  { %v213_v46 = vpop.xlane.xlu1 %212 }
 0x193   :  { %v220_v47 = vmul.f32 0.015625, %v213_v46  ;;  %v207_v48 = vpop.xlane.xlu0 %206 }
 0x194   :  { %v218_v49 = vmul.f32 0.015625, %v207_v48 }
 0x195   :  { %v224_v50 = vsub.f32 %v203_v35, %v220_v47 }
 0x196   :  { %v222_v51 = vsub.f32 %v201_v38, %v218_v49  ;;  %v216_v52 = vpop.xlane.xlu1 %215 }
 0x197   :  { %v221_v53 = vmul.f32 0.015625, %v216_v52  ;;  %v210_v54 = vpop.xlane.xlu0 %209  ;;  %v228_v60 = vmul.f32 %v224_v50, %v224_v50 }
 0x198   :  { %v219_v55 = vmul.f32 0.015625, %v210_v54  ;;  %v226_v56 = vmul.f32 %v222_v51, %v222_v51 }
 0x199   :  { %v225_v57 = vsub.f32 %v204_v41, %v221_v53  ;;  %v236_v62 = vsel %vm28_vm0, %v228_v60, 0.0 }
 0x19a   :  { %v223_v58 = vsub.f32 %v202_v43, %v219_v55  ;;  %v230_v59 = vsel %vm28_vm0, %v226_v56, 0.0 }
 0x19b   :  { %231 = vadd.xlane.f32.xlu0 %v230_v59  ;;  %v229_v0 = vmul.f32 %v225_v57, %v225_v57 }
 0x19c   :  { %v227_v61 = vmul.f32 %v223_v58, %v223_v58 }
 0x19d   :  { %v239_v1 = vsel %vm28_vm0, %v229_v0, 0.0 }
 0x19e   :  { %v233_v63 = vsel %vm28_vm0, %v227_v61, 0.0 }
 0x19f   :  { %237 = vadd.xlane.f32.xlu0 %v236_v62  ;;  %234 = vadd.xlane.f32.xlu1 %v233_v63 }
 0x1a3   :  { %240 = vadd.xlane.f32.xlu1 %v239_v1 }
 0x228   :  { %v232_v2 = vpop.xlane.xlu0 %231 }
 0x229   :  { %v242_v3 = vmul.f32 0.015625, %v232_v2 }
 0x22b   :  { %v246_v4 = vadd.f32 1e-12, %v242_v3 }
 0x22c   :  { %v235_v5 = vpop.xlane.xlu1 %234  ;;  %v238_v6 = vpop.xlane.xlu0 %237 }
 0x22d   :  { %376 = vrsqrt.f32 %v246_v4  ;;  %v243_v7 = vmul.f32 0.015625, %v235_v5  ;;  %v244_v8 = vmul.f32 0.015625, %v238_v6 }
 0x22f   :  { %v247_v9 = vadd.f32 1e-12, %v243_v7  ;;  %v248_v10 = vadd.f32 1e-12, %v244_v8 }
 0x230   :  { %v241_v11 = vpop.xlane.xlu1 %240 }
 0x231   :  { %378 = vrsqrt.f32 %v247_v9  ;;  %v245_v12 = vmul.f32 0.015625, %v241_v11 }
 0x232   :  { %380 = vrsqrt.f32 %v248_v10 }
 0x233   :  { %v249_v13 = vadd.f32 1e-12, %v245_v12 }
 0x235   :  { %382 = vrsqrt.f32 %v249_v13 }
 0x237   :  { %v377_v14 = vpop.eup %376 }
 0x238   :  { %v254_v16 = vmul.f32 %v377_v14, %v222_v51 }
 0x23a   :  { %v265_v18 = vmul.f32 %v316_v15, %v254_v16 }
 0x23b   :  { %v379_v19 = vpop.eup %378 }
 0x23c   :  { %v381_v20 = vpop.eup %380  ;;  %v276_v21 = vadd.f32 %v317_v17, %v265_v18  ;;  %v255_v22 = vmul.f32 %v379_v19, %v223_v58 }
 0x23d   :  { %v256_v23 = vmul.f32 %v381_v20, %v224_v50 }
 0x23e   :  { %v322_v24 = vpack.c.bf16 %v276_v21, %v276_v21  ;;  %v266_v25 = vmul.f32 %v316_v15, %v255_v22 }
 0x23f   :  { %v383_v26 = vpop.eup %382  ;;  %v267_v27 = vmul.f32 %v316_v15, %v256_v23 }
 0x240   :  { %297 = vst.msk [vmem:[%s503_s6] sm:$0xf] %vm296_vm1, %v322_v24  ;;  %v277_v28 = vadd.f32 %v317_v17, %v266_v25  ;;  %v257_v29 = vmul.f32 %v383_v26, %v225_v57 }
 0x241   :  { %v278_v30 = vadd.f32 %v317_v17, %v267_v27 }
 0x242   :  { %v323_v31 = vpack.c.bf16 %v277_v28, %v277_v28  ;;  %v268_v32 = vmul.f32 %v316_v15, %v257_v29 }
 0x243   :  { %v324_v33 = vpack.c.bf16 %v278_v30, %v278_v30 }
 0x244   :  { %298 = vst.msk [vmem:[%s503_s6 + $0x4] sm:$0xf] %vm296_vm1, %v323_v31  ;;  %v279_v34 = vadd.f32 %v317_v17, %v268_v32 }
 0x245   :  { %299 = vst.msk [vmem:[%s503_s6 + $0x8] sm:$0xf] %vm296_vm1, %v324_v33 }
 0x246   :  { %v325_v35 = vpack.c.bf16 %v279_v34, %v279_v34 }
 0x248   :  { %300 = vst.msk [vmem:[%s503_s6 + $0xc] sm:$0xf] %vm296_vm1, %v325_v35 }

// kernel: next_sentence_prediction_forward.23
= control target key start
LH: loop header
LB: loop body
LE: loop exit
PB: predicated region body
PF: predicated region fallthrough
CT: control target
= control target key end

     0   :  { %v288_v1 = vmov 0.0   ;;  %vm289_vm0 = vmmov 0   ;;  %s368_s0 = inlined_call_operand.vmem [shape: bf16[2,64], index: 0, kind: input, shape index: {}]   ;;  %s369_s1 = inlined_call_operand.vmem [shape: bf16[64,64], index: 1, kind: input, shape index: {}]   ;;  %s370_s2 = inlined_call_operand.vmem [shape: f32[1,64], index: 2, kind: input, shape index: {}]   ;;  %s371_s3 = inlined_call_operand.vmem [shape: bf16[64,128], index: 3, kind: input, shape index: {}]   ;;  %s372_s4 = inlined_call_operand.vmem [shape: f32[1,128], index: 4, kind: input, shape index: {}]   ;;  %s373_s5 = inlined_call_operand.hbm [shape: f32[2,128], index: 5, kind: output, shape index: {}]  }
   0x1   :  { %v254_v0 = vld [vmem:[%s369_s1] sm:$0xff]   ;;  %227 = vmatprep.subr.bf16.mxu0 %v288_v1  ;;  %239 = vmatprep.subr.bf16.mxu1 %v288_v1  ;;  %v255_v2 = vld [vmem:[%s369_s1 + $0x8] sm:$0xff]   ;;  %v256_v3 = vld [vmem:[%s369_s1 + $0x10] sm:$0xff]  }
   0x2   :  { %228 = vmatpush3.bf16.msra.mxu0 %v254_v0  ;;  %235 = vmatprep.mubr.msk.bf16.mxu0 %vm289_vm0, %v288_v1 }
   0x3   :  { %229 = vmatprep.subr.bf16.mxu0 %v288_v1  ;;  %247 = vmatprep.mubr.msk.bf16.mxu1 %vm289_vm0, %v288_v1 }
   0x6   :  { %230 = vmatpush3.bf16.msra.mxu0 %v255_v2 }
   0x7   :  { %231 = vmatprep.subr.bf16.mxu0 %v288_v1 }
   0x8   :  { %10 = vsyncpa [#allocation3], 0  ;;  %v257_v4 = vld [vmem:[%s369_s1 + $0x18] sm:$0xff]   ;;  %v22_v5 = vld [vmem:[%s368_s0] sm:$0x1]  ;;  %vm62_vm1 = vcmask 523264  }
   0x9   :  { %v258_v6 = vld [vmem:[%s371_s3] sm:$0xff]   ;;  %v259_v7 = vld [vmem:[%s371_s3 + $0x8] sm:$0xff]   ;;  %v260_v8 = vld [vmem:[%s371_s3 + $0x10] sm:$0xff]  }
   0xa   :  { %232 = vmatpush3.bf16.msra.mxu0 %v256_v3  ;;  %240 = vmatpush3.bf16.msra.mxu1 %v258_v6  ;;  %v261_v9 = vld [vmem:[%s371_s3 + $0x18] sm:$0xff]   ;;  %v205_v10 = vld [vmem:[%s370_s2] ss:$0 sm:$0xff]  ;;  %s290_s3 = smov [#allocation2]  }
   0xb   :  { %233 = vmatprep.subr.bf16.mxu0 %v288_v1  ;;  %241 = vmatprep.subr.bf16.mxu1 %v288_v1  ;;  %v211_v18 = vld [vmem:[%s372_s4] ss:$0 sm:$0xff]  ;;  %s197_s13 = sshll.u32 %s290_s3, 4  ;;  %s198_s13 = int_to_ptr.vmem [resolvable:$true] %s197_s13 }
   0xc   :  { %s264_s2 = scalar_lea.vmem %s198_s13, 32  ;;  %p269_p1 = scmp.lt.s32.totalorder %s198_s13, %s198_s13 }
   0xd   :  { %p265_p0 = scmp.ne.s32.totalorder %s198_s13, %s264_s2  ;;  %p270_p2 = scmp.lt.s32.totalorder %s264_s2, %s264_s2 }
   0xe   :  { %234 = vmatpush3.bf16.msra.mxu0 %v257_v4  ;;  %242 = vmatpush3.bf16.msra.mxu1 %v259_v7 }
   0xf   :  { %243 = vmatprep.subr.bf16.mxu1 %v288_v1  ;;  %p271_p3 = por %p270_p2, %p269_p1 }
  0x11   :  { %236 = vmatmul.mubr.msk.bf16.vlgmr.msra.gmra.mrb[0].mxu0 %vm62_vm1, %v22_v5  ;;  %p272_p4 = pnand %p271_p3, %p265_p0 }
  0x12   :  { %244 = vmatpush3.bf16.msra.mxu1 %v260_v8 }
  0x13   :  { %245 = vmatprep.subr.bf16.mxu1 %v288_v1 }
  0x16   :  { %246 = vmatpush3.bf16.msra.mxu1 %v261_v9 }
  0xe4   :  { %v100_v11 = vpop.f32.mrb[0].mxu0 }
  0xe5   :  { %v101_v12 = vadd.f32 %v205_v10, %v100_v11  ;;  %v237_v13 = vpop.f32.mrb[1].mxu0 }
  0xe6   :  { %v103_v14 = vpop.f32.mrb[2].mxu0 }
  0xe7   :  { %262 = vtanh.f32 %v101_v12  ;;  %v238_v15 = vpop.f32.mrb[3].mxu0 }
  0xf1   :  { %v263_v16 = vpop.eup %262 }
  0xf2   :  { %v107_v17 = vpack.c.bf16 %v263_v16, %v263_v16 }
  0xf4   :  { %248 = vmatmul.mubr.msk.bf16.vlgmr.msra.gmra.mrb[0].mxu1 %vm62_vm1, %v107_v17 }
 0x1c7   :  { %v184_v19 = vpop.f32.mrb[0].mxu1 }
 0x1c8   :  { %v185_v20 = vadd.f32 %v211_v18, %v184_v19  ;;  %v249_v21 = vpop.f32.mrb[1].mxu1 }
 0x1c9   :  { %v187_v22 = vpop.f32.mrb[2].mxu1 }
 0x1ca   :  { %190 = vst [vmem:[#allocation2] sm:$0x3] %v185_v20  ;;  %v250_v23 = vpop.f32.mrb[3].mxu1 }
 0x1cb   :  { %275 = shalt.err (!%p272_p4)
}
 0x1cc   :  { %s276_s4 = scalar_lea.hbm %s373_s5, 32 }
 0x1cd   :  { %p277_p5 = scmp.ne.s32.totalorder %s373_s5, %s276_s4  ;;  %p280_p6 = scmp.lt.u32.totalorder %s276_s4, %s373_s5 }
 0x1cf   :  { %p282_p7 = pnand %p280_p6, %p277_p5 }
 0x1d1   :  { %285 = shalt.err (!%p282_p7)
}
 0x1d2   :  { %200 = dma.vmem_to_hbm [thread:$0]  %s198_s13, 32, %s373_s5, [#allocation3]  }
 0x1d3   :  { %286 = dma.done.wait [#allocation3], 32  }
 0x1d4   :  { %287 = vsyncadd [#allocation3], 4294967264 }
 0x1d5   :  { %204 = vsyncpa [#allocation3], 1 }

</bundles_post_ra>
